<compile_context>
chip_gen: v5e
topology: v5e:2x2
jax: 0.10.0
libtpu: 0.0.40
codegen_flags: <defaults>
</compile_context>

<pallas_src>
import jax
import jax.numpy as jnp
from jax.experimental import pallas as pl
from jax.experimental.pallas import tpu as pltpu


# ----------------------------------------------------------------------------
# Pallas kernel: fused block-diagonal MLP (Linear->ReLU->Linear->ReLU->Linear)
# over all K neighbors at once, followed by masked max over the K row-blocks.
#
#   feat_ref : (K*Fp, tm)   bf16   row f*K + k = feature f of neighbor k
#                                  (row f == F is the validity mask of nbr k)
#   msel_ref : (K, K*Fp)    bf16   selection matrix pulling the mask rows out
#   w*_ref   : fused block-diag bf16 weights; b*_ref: f32 bias columns
#   out_ref  : (Cout, tm)   f32    lane-dense stores
# ----------------------------------------------------------------------------
def _pointnet_conv_kernel(feat_ref, msel_ref,
                          w0_ref, b0_ref, w1_ref, b1_ref, w2_ref, b2_ref,
                          out_ref):
    K = msel_ref.shape[0]
    cout, tm = out_ref.shape
    NEG = jnp.float32(jnp.finfo(jnp.float32).min)      # finite sentinel (no -inf)

    f = feat_ref[...]                                                   # (K*Fp, tm) bf16

    # Recover the per-neighbor validity mask (exact 0/1) from the slab with a
    # tiny selection matmul — avoids a separate mask input stream.
    mask = jnp.dot(msel_ref[...], f, preferred_element_type=jnp.float32)  # (K, tm)

    # Fused block-diagonal MLP: one fat MXU matmul per layer per tile.
    h = jnp.dot(w0_ref[...], f, preferred_element_type=jnp.float32) + b0_ref[...]
    h = jnp.maximum(h, 0.0).astype(jnp.bfloat16)                        # (K*H, tm)
    h = jnp.dot(w1_ref[...], h, preferred_element_type=jnp.float32) + b1_ref[...]
    h = jnp.maximum(h, 0.0).astype(jnp.bfloat16)                        # (K*H, tm)
    h = jnp.dot(w2_ref[...], h, preferred_element_type=jnp.float32) + b2_ref[...]
    # h: (K*Cout, tm) f32, rows grouped per neighbor k (k-major).

    # Masked max over the K neighbor blocks — pure VPU elementwise work.
    acc = jnp.full((cout, tm), NEG, jnp.float32)
    for k in range(K):
        blk = h[k * cout:(k + 1) * cout, :]                             # (Cout, tm)
        mk = mask[k:k + 1, :] > 0.5                                     # (1, tm)
        acc = jnp.maximum(acc, jnp.where(mk, blk, NEG))

    # Targets with zero valid neighbors -> 0 (scatter-max fill semantics).
    has_nbr = jnp.max(mask, axis=0, keepdims=True) > 0.5
    out_ref[...] = jnp.where(has_nbr, acc, 0.0)


# ----------------------------------------------------------------------------
# Fused (block-diagonal) weight construction.
# feat slab rows are f-major: row f*K + k = feature f of neighbor k; f == F is
# the mask row, any further rows are zero padding. Hidden rows are k-major.
# ----------------------------------------------------------------------------
def _build_fused_params(params, K, Fp):
    w0, b0, w1, b1, w2, b2 = params
    F, H = w0.shape
    cout = w2.shape[1]
    eyeK = jnp.eye(K, dtype=jnp.float32)

    w0p = jnp.pad(w0, ((0, Fp - F), (0, 0)))               # (Fp, H); mask/pad rows -> 0
    # W0f[k*H + h, f*K + k'] = w0p[f, h] * delta(k, k')
    w0f = jnp.einsum('fh,kc->khfc', w0p, eyeK).reshape(K * H, Fp * K)
    w1f = jnp.kron(eyeK, w1.T)                              # (K*H, K*H)   256-deep
    w2f = jnp.kron(eyeK, w2.T)                              # (K*Cout, K*H) 256-deep

    b0f = jnp.tile(b0.reshape(1, H), (K, 1)).reshape(K * H, 1)
    b1f = jnp.tile(b1.reshape(1, H), (K, 1)).reshape(K * H, 1)
    b2f = jnp.tile(b2.reshape(1, cout), (K, 1)).reshape(K * cout, 1)

    # Selection matrix pulling the K mask rows (f == F) back out of the slab.
    msel = jnp.zeros((K, Fp * K), jnp.float32)
    msel = msel.at[jnp.arange(K), F * K + jnp.arange(K)].set(1.0)

    return (msel.astype(jnp.bfloat16),
            w0f.astype(jnp.bfloat16), b0f.astype(jnp.float32),
            w1f.astype(jnp.bfloat16), b1f.astype(jnp.float32),
            w2f.astype(jnp.bfloat16), b2f.astype(jnp.float32))


def pointnet_conv(feat_slab, fused, *, cout, tm):
    """feat_slab: [K*Fp, Mp] bf16 (mask folded in); returns [Cout, Mp] f32."""
    rows, Mp = feat_slab.shape
    assert Mp % tm == 0 and tm % 128 == 0
    msel, w0f, b0f, w1f, b1f, w2f, b2f = fused

    def full(arr):
        return pl.BlockSpec(arr.shape, lambda i: (0,) * arr.ndim)

    return pl.pallas_call(
        _pointnet_conv_kernel,
        out_shape=jax.ShapeDtypeStruct((cout, Mp), jnp.float32),
        grid_spec=pltpu.PrefetchScalarGridSpec(
            num_scalar_prefetch=0,
            grid=(Mp // tm,),
            in_specs=[
                pl.BlockSpec((rows, tm), lambda i: (0, i)),     # feat slab
                full(msel),
                full(w0f), full(b0f),
                full(w1f), full(b1f),
                full(w2f), full(b2f),
            ],
            out_specs=pl.BlockSpec((cout, tm), lambda i: (0, i)),  # lane-dense out
        ),
        compiler_params=pltpu.CompilerParams(
            dimension_semantics=("parallel",)),
    )(feat_slab, msel, w0f, b0f, w1f, b1f, w2f, b2f)


# ----------------------------------------------------------------------------
# Plain-JAX glue: farthest point sampling, radius neighborhood, edge gather.
# ----------------------------------------------------------------------------
def fps_single(pos, n_sample):
    """Deterministic FPS (starts from index 0; torch_geometric uses random start)."""
    N = pos.shape[0]

    def body(i, state):
        idx, dists = state
        last = pos[idx[i - 1]]
        d = jnp.sum((pos - last) ** 2, axis=-1)
        dists = jnp.minimum(dists, d)
        nxt = jnp.argmax(dists).astype(jnp.int32)
        return idx.at[i].set(nxt), dists

    idx0 = jnp.zeros((n_sample,), jnp.int32)
    dists0 = jnp.full((N,), jnp.inf, jnp.float32)
    idx, _ = jax.lax.fori_loop(1, n_sample, body, (idx0, dists0))
    return idx


def fps_batched(pos, batch, num_batches, ratio):
    """Assumes contiguous equal-size batches (as constructed in __main__)."""
    N = pos.shape[0]
    per = N // num_batches
    n_sample = max(1, int(round(ratio * per)))
    idxs = []
    for b in range(num_batches):
        sl = pos[b * per:(b + 1) * per]
        idxs.append(fps_single(sl, n_sample) + b * per)
    return jnp.concatenate(idxs, axis=0)


def radius_neighbors(pos, batch, sample_idx, r, K):
    """For each sampled point return up to K neighbors within radius r
    (K nearest within the ball; torch_geometric returns the first K found)."""
    y = pos[sample_idx]                      # [M, D]
    by = batch[sample_idx]                   # [M]
    d2 = jnp.sum((y[:, None, :] - pos[None, :, :]) ** 2, axis=-1)   # [M, N]
    valid = (by[:, None] == batch[None, :]) & (d2 <= r * r)
    d2m = jnp.where(valid, d2, jnp.inf)
    order = jnp.argsort(d2m, axis=1)[:, :K]                         # [M, K]
    mask = jnp.take_along_axis(valid, order, axis=1)
    return order.astype(jnp.int32), mask.astype(jnp.float32)


def _round_up(a, b):
    return ((a + b - 1) // b) * b


def sa_module_forward(x, pos, batch, params, *, num_batches, ratio, radius, K,
                      tm=2048):
    Cin = x.shape[1]
    D = pos.shape[1]
    F = Cin + D
    Fp = F + 1                          # +1 row per neighbor for the validity mask
    while (K * Fp) % 16:                # keep the bf16 slab sublane-tile aligned
        Fp += 1

    sample_idx = fps_batched(pos, batch, num_batches, ratio)             # [M]
    nbr_idx, mask = radius_neighbors(pos, batch, sample_idx, radius, K)  # [M,K],[M,K]
    M = sample_idx.shape[0]

    # Tile: multiple of 128; default 2048 keeps the per-step working set well
    # under v7x's 64 MiB VMEM; prefer >= 2 grid steps so both v7x TensorCores
    # get work on the "parallel" axis.
    tm_eff = _round_up(min(tm, _round_up(M, 128)), 128)
    if _round_up(M, 128) >= 256 and _round_up(M, tm_eff) // tm_eff < 2:
        tm_eff = _round_up(_round_up(M, 256) // 2, 128)
    Mp = _round_up(M, tm_eff)
    pad = Mp - M

    # Gather straight into the lane-dense (feature-major, M-last) layout — no
    # [M, K, F] intermediate and no full-slab transpose afterwards.
    nbr_t = nbr_idx.T                                      # [K, M]
    xt = x.T                                               # [Cin, N]
    pt = pos.T                                             # [D, N]
    x_j = xt[:, nbr_t]                                     # [Cin, K, M]
    rel = pt[:, nbr_t] - pt[:, sample_idx][:, None, :]     # [D, K, M]
    parts = [x_j, rel, mask.T[None, :, :]]                 # mask rides as row f == F
    if Fp > F + 1:
        parts.append(jnp.zeros((Fp - F - 1, K, M), x.dtype))
    feat = jnp.concatenate(parts, axis=0)                  # [Fp, K, M]
    feat = jnp.pad(feat, ((0, 0), (0, 0), (0, pad)))
    feat_slab = feat.reshape(Fp * K, Mp).astype(jnp.bfloat16)   # [K*Fp, Mp]

    cout = params[4].shape[1]
    fused = _build_fused_params(params, K, Fp)
    out_t = pointnet_conv(feat_slab, fused, cout=cout, tm=tm_eff)        # [Cout, Mp]
    x_out = out_t[:, :M].T                                               # [M, Cout]
    return x_out, pos[sample_idx], batch[sample_idx]


# ----------------------------------------------------------------------------
def init_mlp_params(key, f_in, hidden, out):
    # tg_nn.MLP([f_in, hidden, hidden, out], act='relu');
    # TODO(synk): torch_geometric MLP default batch_norm is omitted (norm=None).
    ks = jax.random.split(key, 3)
    def lin(k, a, b):
        w = jax.random.normal(k, (a, b), jnp.float32) * (1.0 / jnp.sqrt(a))
        return w, jnp.zeros((1, b), jnp.float32)
    w0, b0 = lin(ks[0], f_in, hidden)
    w1, b1 = lin(ks[1], hidden, hidden)
    w2, b2 = lin(ks[2], hidden, out)
    return (w0, b0, w1, b1, w2, b2)


if __name__ == "__main__":
    # Module hyperparameters
    data_dim = 3
    in_channels = 4
    out_channels = 16
    mlp_num_hidden = 32
    mlp_num_layers = 2          # -> channels [7, 32, 32, 16]
    sampling_ratio = 0.25
    sampling_radius = 0.6
    max_num_neighbors = 8

    # Small deterministic inputs: 2 batches x 32 points
    num_batches = 2
    points_per_batch = 32
    N = num_batches * points_per_batch

    key = jax.random.PRNGKey(0)
    k_pos, k_x, k_p = jax.random.split(key, 3)
    pos = jax.random.uniform(k_pos, (N, data_dim), jnp.float32)
    x = jax.random.normal(k_x, (N, in_channels), jnp.float32)
    batch = jnp.repeat(jnp.arange(num_batches, dtype=jnp.int32), points_per_batch)

    params = init_mlp_params(k_p, in_channels + data_dim, mlp_num_hidden, out_channels)

    x_out, pos_out, batch_out = sa_module_forward(
        x, pos, batch, params,
        num_batches=num_batches, ratio=sampling_ratio,
        radius=sampling_radius, K=max_num_neighbors, tm=2048)

    jax.block_until_ready((x_out, pos_out, batch_out))
    assert x_out.shape == (16, out_channels)
    assert pos_out.shape == (16, data_dim)
    assert batch_out.shape == (16,)
    assert bool(jnp.all(jnp.isfinite(x_out)))
    print("KERNEL_OK")
</pallas_src>

<mosaic_0001>
module attributes {stable_mosaic.version = 11 : i64} {
  func.func @_pointnet_conv_kernel(%arg0: i32, %arg1: memref<64x128xbf16, #tpu.memory_space<vmem>>, %arg2: memref<8x64xbf16, #tpu.memory_space<vmem>>, %arg3: memref<256x64xbf16, #tpu.memory_space<vmem>>, %arg4: memref<256x1xf32, #tpu.memory_space<vmem>>, %arg5: memref<256x256xbf16, #tpu.memory_space<vmem>>, %arg6: memref<256x1xf32, #tpu.memory_space<vmem>>, %arg7: memref<128x256xbf16, #tpu.memory_space<vmem>>, %arg8: memref<128x1xf32, #tpu.memory_space<vmem>>, %arg9: memref<16x128xf32, #tpu.memory_space<vmem>>) attributes {dimension_semantics = [#tpu.dimension_semantics<parallel>], iteration_bounds = array<i64: 1>, scalar_prefetch = 0 : i64, scratch_operands = 0 : i64, tpu.core_type = #tpu.core_type<tc>, window_params = [{transform_indices = @transform_0, window_bounds = array<i64: 64, 128>}, {pipeline_mode = #tpu.pipeline_mode<synchronous>, transform_indices = @transform_1, window_bounds = array<i64: 8, 64>}, {pipeline_mode = #tpu.pipeline_mode<synchronous>, transform_indices = @transform_2, window_bounds = array<i64: 256, 64>}, {pipeline_mode = #tpu.pipeline_mode<synchronous>, transform_indices = @transform_3, window_bounds = array<i64: 256, 1>}, {pipeline_mode = #tpu.pipeline_mode<synchronous>, transform_indices = @transform_4, window_bounds = array<i64: 256, 256>}, {pipeline_mode = #tpu.pipeline_mode<synchronous>, transform_indices = @transform_5, window_bounds = array<i64: 256, 1>}, {pipeline_mode = #tpu.pipeline_mode<synchronous>, transform_indices = @transform_6, window_bounds = array<i64: 128, 256>}, {pipeline_mode = #tpu.pipeline_mode<synchronous>, transform_indices = @transform_7, window_bounds = array<i64: 128, 1>}, {transform_indices = @transform_8, window_bounds = array<i64: 16, 128>}]} {
    %c0 = arith.constant 0 : index
    %c0_0 = arith.constant 0 : index
    %0 = vector.load %arg1[%c0, %c0_0] : memref<64x128xbf16, #tpu.memory_space<vmem>>, vector<64x128xbf16>
    %c0_1 = arith.constant 0 : index
    %c0_2 = arith.constant 0 : index
    %1 = vector.load %arg2[%c0_1, %c0_2] : memref<8x64xbf16, #tpu.memory_space<vmem>>, vector<8x64xbf16>
    %cst = arith.constant dense<0.000000e+00> : vector<8x128xf32>
    %2 = tpu.matmul %1, %0, %cst {dimension_numbers = #tpu.dot_dimension_numbers<[1], [0], [0], [1], [0, 0, 1, 1], [], []>} : vector<8x64xbf16>, vector<64x128xbf16>, vector<8x128xf32> -> vector<8x128xf32>
    %c0_3 = arith.constant 0 : index
    %c0_4 = arith.constant 0 : index
    %3 = vector.load %arg3[%c0_3, %c0_4] : memref<256x64xbf16, #tpu.memory_space<vmem>>, vector<256x64xbf16>
    %cst_5 = arith.constant dense<0.000000e+00> : vector<256x128xf32>
    %4 = tpu.matmul %3, %0, %cst_5 {dimension_numbers = #tpu.dot_dimension_numbers<[1], [0], [0], [1], [0, 0, 1, 1], [], []>} : vector<256x64xbf16>, vector<64x128xbf16>, vector<256x128xf32> -> vector<256x128xf32>
    %c0_6 = arith.constant 0 : index
    %c0_7 = arith.constant 0 : index
    %5 = vector.load %arg4[%c0_6, %c0_7] : memref<256x1xf32, #tpu.memory_space<vmem>>, vector<256x1xf32>
    %6 = vector.broadcast %5 : vector<256x1xf32> to vector<256x128xf32>
    %7 = arith.addf %4, %6 : vector<256x128xf32>
    %cst_8 = arith.constant 0.000000e+00 : f32
    %8 = vector.broadcast %cst_8 : f32 to vector<256x128xf32>
    %9 = arith.maximumf %7, %8 : vector<256x128xf32>
    %10 = arith.truncf %9 : vector<256x128xf32> to vector<256x128xbf16>
    %c0_9 = arith.constant 0 : index
    %c0_10 = arith.constant 0 : index
    %11 = vector.load %arg5[%c0_9, %c0_10] : memref<256x256xbf16, #tpu.memory_space<vmem>>, vector<256x256xbf16>
    %cst_11 = arith.constant dense<0.000000e+00> : vector<256x128xf32>
    %12 = tpu.matmul %11, %10, %cst_11 {dimension_numbers = #tpu.dot_dimension_numbers<[1], [0], [0], [1], [0, 0, 1, 1], [], []>} : vector<256x256xbf16>, vector<256x128xbf16>, vector<256x128xf32> -> vector<256x128xf32>
    %c0_12 = arith.constant 0 : index
    %c0_13 = arith.constant 0 : index
    %13 = vector.load %arg6[%c0_12, %c0_13] : memref<256x1xf32, #tpu.memory_space<vmem>>, vector<256x1xf32>
    %14 = vector.broadcast %13 : vector<256x1xf32> to vector<256x128xf32>
    %15 = arith.addf %12, %14 : vector<256x128xf32>
    %cst_14 = arith.constant 0.000000e+00 : f32
    %16 = vector.broadcast %cst_14 : f32 to vector<256x128xf32>
    %17 = arith.maximumf %15, %16 : vector<256x128xf32>
    %18 = arith.truncf %17 : vector<256x128xf32> to vector<256x128xbf16>
    %c0_15 = arith.constant 0 : index
    %c0_16 = arith.constant 0 : index
    %19 = vector.load %arg7[%c0_15, %c0_16] : memref<128x256xbf16, #tpu.memory_space<vmem>>, vector<128x256xbf16>
    %cst_17 = arith.constant dense<0.000000e+00> : vector<128x128xf32>
    %20 = tpu.matmul %19, %18, %cst_17 {dimension_numbers = #tpu.dot_dimension_numbers<[1], [0], [0], [1], [0, 0, 1, 1], [], []>} : vector<128x256xbf16>, vector<256x128xbf16>, vector<128x128xf32> -> vector<128x128xf32>
    %c0_18 = arith.constant 0 : index
    %c0_19 = arith.constant 0 : index
    %21 = vector.load %arg8[%c0_18, %c0_19] : memref<128x1xf32, #tpu.memory_space<vmem>>, vector<128x1xf32>
    %22 = vector.broadcast %21 : vector<128x1xf32> to vector<128x128xf32>
    %23 = arith.addf %20, %22 : vector<128x128xf32>
    %cst_20 = arith.constant -3.40282347E+38 : f32
    %24 = vector.broadcast %cst_20 : f32 to vector<16x128xf32>
    %25 = vector.extract_strided_slice %23 {offsets = [0, 0], sizes = [16, 128], strides = [1, 1]} : vector<128x128xf32> to vector<16x128xf32>
    %26 = vector.extract_strided_slice %2 {offsets = [0, 0], sizes = [1, 128], strides = [1, 1]} : vector<8x128xf32> to vector<1x128xf32>
    %cst_21 = arith.constant 5.000000e-01 : f32
    %27 = vector.broadcast %cst_21 : f32 to vector<1x128xf32>
    %28 = arith.cmpf ogt, %26, %27 : vector<1x128xf32>
    %cst_22 = arith.constant -3.40282347E+38 : f32
    %29 = vector.shape_cast %28 : vector<1x128xi1> to vector<1x128xi1>
    %30 = vector.broadcast %29 : vector<1x128xi1> to vector<16x128xi1>
    %31 = vector.broadcast %cst_22 : f32 to vector<16x128xf32>
    %32 = arith.select %30, %25, %31 : vector<16x128xi1>, vector<16x128xf32>
    %33 = arith.maximumf %24, %32 : vector<16x128xf32>
    %34 = vector.extract_strided_slice %23 {offsets = [16, 0], sizes = [16, 128], strides = [1, 1]} : vector<128x128xf32> to vector<16x128xf32>
    %35 = vector.extract_strided_slice %2 {offsets = [1, 0], sizes = [1, 128], strides = [1, 1]} : vector<8x128xf32> to vector<1x128xf32>
    %cst_23 = arith.constant 5.000000e-01 : f32
    %36 = vector.broadcast %cst_23 : f32 to vector<1x128xf32>
    %37 = arith.cmpf ogt, %35, %36 : vector<1x128xf32>
    %cst_24 = arith.constant -3.40282347E+38 : f32
    %38 = vector.shape_cast %37 : vector<1x128xi1> to vector<1x128xi1>
    %39 = vector.broadcast %38 : vector<1x128xi1> to vector<16x128xi1>
    %40 = vector.broadcast %cst_24 : f32 to vector<16x128xf32>
    %41 = arith.select %39, %34, %40 : vector<16x128xi1>, vector<16x128xf32>
    %42 = arith.maximumf %33, %41 : vector<16x128xf32>
    %43 = vector.extract_strided_slice %23 {offsets = [32, 0], sizes = [16, 128], strides = [1, 1]} : vector<128x128xf32> to vector<16x128xf32>
    %44 = vector.extract_strided_slice %2 {offsets = [2, 0], sizes = [1, 128], strides = [1, 1]} : vector<8x128xf32> to vector<1x128xf32>
    %cst_25 = arith.constant 5.000000e-01 : f32
    %45 = vector.broadcast %cst_25 : f32 to vector<1x128xf32>
    %46 = arith.cmpf ogt, %44, %45 : vector<1x128xf32>
    %cst_26 = arith.constant -3.40282347E+38 : f32
    %47 = vector.shape_cast %46 : vector<1x128xi1> to vector<1x128xi1>
    %48 = vector.broadcast %47 : vector<1x128xi1> to vector<16x128xi1>
    %49 = vector.broadcast %cst_26 : f32 to vector<16x128xf32>
    %50 = arith.select %48, %43, %49 : vector<16x128xi1>, vector<16x128xf32>
    %51 = arith.maximumf %42, %50 : vector<16x128xf32>
    %52 = vector.extract_strided_slice %23 {offsets = [48, 0], sizes = [16, 128], strides = [1, 1]} : vector<128x128xf32> to vector<16x128xf32>
    %53 = vector.extract_strided_slice %2 {offsets = [3, 0], sizes = [1, 128], strides = [1, 1]} : vector<8x128xf32> to vector<1x128xf32>
    %cst_27 = arith.constant 5.000000e-01 : f32
    %54 = vector.broadcast %cst_27 : f32 to vector<1x128xf32>
    %55 = arith.cmpf ogt, %53, %54 : vector<1x128xf32>
    %cst_28 = arith.constant -3.40282347E+38 : f32
    %56 = vector.shape_cast %55 : vector<1x128xi1> to vector<1x128xi1>
    %57 = vector.broadcast %56 : vector<1x128xi1> to vector<16x128xi1>
    %58 = vector.broadcast %cst_28 : f32 to vector<16x128xf32>
    %59 = arith.select %57, %52, %58 : vector<16x128xi1>, vector<16x128xf32>
    %60 = arith.maximumf %51, %59 : vector<16x128xf32>
    %61 = vector.extract_strided_slice %23 {offsets = [64, 0], sizes = [16, 128], strides = [1, 1]} : vector<128x128xf32> to vector<16x128xf32>
    %62 = vector.extract_strided_slice %2 {offsets = [4, 0], sizes = [1, 128], strides = [1, 1]} : vector<8x128xf32> to vector<1x128xf32>
    %cst_29 = arith.constant 5.000000e-01 : f32
    %63 = vector.broadcast %cst_29 : f32 to vector<1x128xf32>
    %64 = arith.cmpf ogt, %62, %63 : vector<1x128xf32>
    %cst_30 = arith.constant -3.40282347E+38 : f32
    %65 = vector.shape_cast %64 : vector<1x128xi1> to vector<1x128xi1>
    %66 = vector.broadcast %65 : vector<1x128xi1> to vector<16x128xi1>
    %67 = vector.broadcast %cst_30 : f32 to vector<16x128xf32>
    %68 = arith.select %66, %61, %67 : vector<16x128xi1>, vector<16x128xf32>
    %69 = arith.maximumf %60, %68 : vector<16x128xf32>
    %70 = vector.extract_strided_slice %23 {offsets = [80, 0], sizes = [16, 128], strides = [1, 1]} : vector<128x128xf32> to vector<16x128xf32>
    %71 = vector.extract_strided_slice %2 {offsets = [5, 0], sizes = [1, 128], strides = [1, 1]} : vector<8x128xf32> to vector<1x128xf32>
    %cst_31 = arith.constant 5.000000e-01 : f32
    %72 = vector.broadcast %cst_31 : f32 to vector<1x128xf32>
    %73 = arith.cmpf ogt, %71, %72 : vector<1x128xf32>
    %cst_32 = arith.constant -3.40282347E+38 : f32
    %74 = vector.shape_cast %73 : vector<1x128xi1> to vector<1x128xi1>
    %75 = vector.broadcast %74 : vector<1x128xi1> to vector<16x128xi1>
    %76 = vector.broadcast %cst_32 : f32 to vector<16x128xf32>
    %77 = arith.select %75, %70, %76 : vector<16x128xi1>, vector<16x128xf32>
    %78 = arith.maximumf %69, %77 : vector<16x128xf32>
    %79 = vector.extract_strided_slice %23 {offsets = [96, 0], sizes = [16, 128], strides = [1, 1]} : vector<128x128xf32> to vector<16x128xf32>
    %80 = vector.extract_strided_slice %2 {offsets = [6, 0], sizes = [1, 128], strides = [1, 1]} : vector<8x128xf32> to vector<1x128xf32>
    %cst_33 = arith.constant 5.000000e-01 : f32
    %81 = vector.broadcast %cst_33 : f32 to vector<1x128xf32>
    %82 = arith.cmpf ogt, %80, %81 : vector<1x128xf32>
    %cst_34 = arith.constant -3.40282347E+38 : f32
    %83 = vector.shape_cast %82 : vector<1x128xi1> to vector<1x128xi1>
    %84 = vector.broadcast %83 : vector<1x128xi1> to vector<16x128xi1>
    %85 = vector.broadcast %cst_34 : f32 to vector<16x128xf32>
    %86 = arith.select %84, %79, %85 : vector<16x128xi1>, vector<16x128xf32>
    %87 = arith.maximumf %78, %86 : vector<16x128xf32>
    %88 = vector.extract_strided_slice %23 {offsets = [112, 0], sizes = [16, 128], strides = [1, 1]} : vector<128x128xf32> to vector<16x128xf32>
    %89 = vector.extract_strided_slice %2 {offsets = [7, 0], sizes = [1, 128], strides = [1, 1]} : vector<8x128xf32> to vector<1x128xf32>
    %cst_35 = arith.constant 5.000000e-01 : f32
    %90 = vector.broadcast %cst_35 : f32 to vector<1x128xf32>
    %91 = arith.cmpf ogt, %89, %90 : vector<1x128xf32>
    %cst_36 = arith.constant -3.40282347E+38 : f32
    %92 = vector.shape_cast %91 : vector<1x128xi1> to vector<1x128xi1>
    %93 = vector.broadcast %92 : vector<1x128xi1> to vector<16x128xi1>
    %94 = vector.broadcast %cst_36 : f32 to vector<16x128xf32>
    %95 = arith.select %93, %88, %94 : vector<16x128xi1>, vector<16x128xf32>
    %96 = arith.maximumf %87, %95 : vector<16x128xf32>
    %cst_37 = arith.constant dense<0xFF800000> : vector<128xf32>
    %97 = vector.multi_reduction <maximumf>, %2, %cst_37 [0] : vector<8x128xf32> to vector<128xf32>
    %98 = vector.shape_cast %97 : vector<128xf32> to vector<1x128xf32>
    %cst_38 = arith.constant 5.000000e-01 : f32
    %99 = vector.broadcast %cst_38 : f32 to vector<1x128xf32>
    %100 = arith.cmpf ogt, %98, %99 : vector<1x128xf32>
    %cst_39 = arith.constant 0.000000e+00 : f32
    %101 = vector.shape_cast %100 : vector<1x128xi1> to vector<1x128xi1>
    %102 = vector.broadcast %101 : vector<1x128xi1> to vector<16x128xi1>
    %103 = vector.broadcast %cst_39 : f32 to vector<16x128xf32>
    %104 = arith.select %102, %96, %103 : vector<16x128xi1>, vector<16x128xf32>
    %c0_40 = arith.constant 0 : index
    %c0_41 = arith.constant 0 : index
    %105 = vector.load %arg9[%c0_40, %c0_41] : memref<16x128xf32, #tpu.memory_space<vmem>>, vector<16x128xf32>
    tpu.vector_store %arg9[%c0_40, %c0_41], %104 {strides = array<i32>} : memref<16x128xf32, #tpu.memory_space<vmem>>, vector<16x128xf32>,
    return
  }
  func.func @transform_0(%arg0: i32) -> (i32, i32) {
    %c0_i32 = arith.constant 0 : i32
    %c0_i32_0 = arith.constant 0 : i32
    return %c0_i32, %arg0 : i32, i32
  }
  func.func @transform_1(%arg0: i32) -> (i32, i32) {
    %c0_i32 = arith.constant 0 : i32
    %c0_i32_0 = arith.constant 0 : i32
    %c0_i32_1 = arith.constant 0 : i32
    return %c0_i32, %c0_i32_0 : i32, i32
  }
  func.func @transform_2(%arg0: i32) -> (i32, i32) {
    %c0_i32 = arith.constant 0 : i32
    %c0_i32_0 = arith.constant 0 : i32
    %c0_i32_1 = arith.constant 0 : i32
    return %c0_i32, %c0_i32_0 : i32, i32
  }
  func.func @transform_3(%arg0: i32) -> (i32, i32) {
    %c0_i32 = arith.constant 0 : i32
    %c0_i32_0 = arith.constant 0 : i32
    %c0_i32_1 = arith.constant 0 : i32
    return %c0_i32, %c0_i32_0 : i32, i32
  }
  func.func @transform_4(%arg0: i32) -> (i32, i32) {
    %c0_i32 = arith.constant 0 : i32
    %c0_i32_0 = arith.constant 0 : i32
    %c0_i32_1 = arith.constant 0 : i32
    return %c0_i32, %c0_i32_0 : i32, i32
  }
  func.func @transform_5(%arg0: i32) -> (i32, i32) {
    %c0_i32 = arith.constant 0 : i32
    %c0_i32_0 = arith.constant 0 : i32
    %c0_i32_1 = arith.constant 0 : i32
    return %c0_i32, %c0_i32_0 : i32, i32
  }
  func.func @transform_6(%arg0: i32) -> (i32, i32) {
    %c0_i32 = arith.constant 0 : i32
    %c0_i32_0 = arith.constant 0 : i32
    %c0_i32_1 = arith.constant 0 : i32
    return %c0_i32, %c0_i32_0 : i32, i32
  }
  func.func @transform_7(%arg0: i32) -> (i32, i32) {
    %c0_i32 = arith.constant 0 : i32
    %c0_i32_0 = arith.constant 0 : i32
    %c0_i32_1 = arith.constant 0 : i32
    return %c0_i32, %c0_i32_0 : i32, i32
  }
  func.func @transform_8(%arg0: i32) -> (i32, i32) {
    %c0_i32 = arith.constant 0 : i32
    %c0_i32_0 = arith.constant 0 : i32
    return %c0_i32, %arg0 : i32, i32
  }
}

</mosaic_0001>

<bundles_post_ra>
// kernel: tpu_custom_call.1
= control target key start
LH: loop header
LB: loop body
LE: loop exit
PB: predicated region body
PF: predicated region fallthrough
CT: control target
= control target key end

     0   :  { %v1941_v3 = vmov 0   ;;  %s2862_s0 = inlined_call_operand.vmem [shape: bf16[64,128], index: 0, kind: input, shape index: {}]   ;;  %s2863_s1 = inlined_call_operand.vmem [shape: bf16[8,64], index: 1, kind: input, shape index: {}]   ;;  %s2864_s2 = inlined_call_operand.vmem [shape: bf16[256,64], index: 2, kind: input, shape index: {}]   ;;  %s2865_s3 = inlined_call_operand.vmem [shape: f32[256,1], index: 3, kind: input, shape index: {}]   ;;  %s2866_s4 = inlined_call_operand.vmem [shape: bf16[256,256], index: 4, kind: input, shape index: {}]   ;;  %s2867_s5 = inlined_call_operand.vmem [shape: f32[256,1], index: 5, kind: input, shape index: {}]   ;;  %s2868_s6 = inlined_call_operand.vmem [shape: bf16[128,256], index: 6, kind: input, shape index: {}]   ;;  %s2869_s7 = inlined_call_operand.vmem [shape: f32[128,1], index: 7, kind: input, shape index: {}]   ;;  %s2870_s8 = inlined_call_operand.hbm [shape: f32[16,128], index: 8, kind: output, shape index: {}]  }
   0x1   :  { %v143_v0 = vld [vmem:[%s2865_s3 + $0xf0] sm:$0xff]  ;;  %v1843_v2 = vld [vmem:[%s2862_s0 + $0x18] sm:$0xff]  ;;  %1913 = vset.pattern.permute.xlu1 %v1941_v3  ;;  %1912 = vset.pattern.permute.xlu0 %v1941_v3  ;;  %v125_v4 = vld [vmem:[%s2865_s3 + $0x60] sm:$0xff] }
   0x2   :  { %v127_v1 = vld [vmem:[%s2865_s3 + $0x70] sm:$0xff]  ;;  %297 = vperm.xlu1 %1913, %v143_v0   ;;  %72 = vmatpush.bf16.msra.mxu1 %v1843_v2  ;;  %v144_v6 = vld [vmem:[%s2865_s3 + $0xf8] sm:$0xff]  ;;  %v1841_v8 = vld [vmem:[%s2862_s0 + $0x8] sm:$0xff] }
   0x3   :  { %217 = vperm.xlu0 %1912, %v127_v1   ;;  %1914 = vset.pattern.permute.xlu2 %v1941_v3  ;;  %v1842_v5 = vld [vmem:[%s2862_s0 + $0x10] sm:$0xff]  ;;  %v128_v7 = vld [vmem:[%s2865_s3 + $0x78] sm:$0xff] }
   0x4   :  { %207 = vperm.xlu2 %1914, %v125_v4  }
   0x6   :  { %73 = vmatpush.bf16.msra.mxu1 %v1842_v5 }
   0x7   :  { %13 = vsyncpa [#allocation3], 0  ;;  %v126_v9 = vld [vmem:[%s2865_s3 + $0x68] sm:$0xff]  ;;  %v1840_v10 = vld [vmem:[%s2862_s0] sm:$0xff]  ;;  %vm64_vm0 = vcmask 523264   ;;  %s1539_s29 = sshll.u32 %s2870_s8, 4  ;;  %s1540_s29 = int_to_ptr.hbm [resolvable:$true] %s1539_s29 }
   0x8   :  { %v142_v11 = vld [vmem:[%s2865_s3 + $0xe8] sm:$0xff]  ;;  %v141_v12 = vld [vmem:[%s2865_s3 + $0xe0] sm:$0xff]  ;;  %v123_v14 = vld [vmem:[%s2865_s3 + $0x50] sm:$0xff]  ;;  %s1943_s30 = smov 128   ;;  %s1944_s9 = smov 8  }
   0x9   :  { %v39_v13 = vld [vmem:[%s2863_s1] sm:$0xf]  ;;  %v139_v15 = vld [vmem:[%s2865_s3 + $0xd0] sm:$0xff]  ;;  %v124_v16 = vld [vmem:[%s2865_s3 + $0x58] sm:$0xff] }
   0xa   :  { %302 = vperm.xlu1 %1913, %v144_v6   ;;  %74 = vmatpush.bf16.msra.mxu1 %v1841_v8  ;;  %v140_v17 = vld [vmem:[%s2865_s3 + $0xd8] sm:$0xff]  ;;  %v122_v18 = vld [vmem:[%s2865_s3 + $0x48] sm:$0xff]  ;;  %v121_v19 = vld [vmem:[%s2865_s3 + $0x40] sm:$0xff] }
   0xb   :  { %222 = vperm.xlu0 %1912, %v128_v7   ;;  %v1844_v20 = vld [vmem:[%s2864_s2] sm:$0xff]  ;;  %v138_v22 = vld [vmem:[%s2865_s3 + $0xc8] sm:$0xff]  ;;  %v119_v23 = vld [vmem:[%s2865_s3 + $0x30] sm:$0xff] }
   0xc   :  { %212 = vperm.xlu2 %1914, %v126_v9   ;;  %v137_v21 = vld [vmem:[%s2865_s3 + $0xc0] sm:$0xff]  ;;  %v120_v24 = vld [vmem:[%s2865_s3 + $0x38] sm:$0xff]  ;;  %v135_v25 = vld [vmem:[%s2865_s3 + $0xb0] sm:$0xff] }
   0xd   :  { %v136_v26 = vld [vmem:[%s2865_s3 + $0xb8] sm:$0xff]  ;;  %v1845_v27 = vld [vmem:[%s2864_s2 + $0x8] sm:$0xff]  ;;  %v117_v28 = vld [vmem:[%s2865_s3 + $0x20] sm:$0xff] }
   0xe   :  { %75 = vmatpush.bf16.msra.mxu1 %v1840_v10  ;;  %v133_v29 = vld [vmem:[%s2865_s3 + $0xa0] sm:$0xff]  ;;  %v118_v30 = vld [vmem:[%s2865_s3 + $0x28] sm:$0xff]  ;;  %v116_v32 = vld [vmem:[%s2865_s3 + $0x18] sm:$0xff] }
   0xf   :  { %v134_v31 = vld [vmem:[%s2865_s3 + $0xa8] sm:$0xff]  ;;  %v115_v33 = vld [vmem:[%s2865_s3 + $0x10] sm:$0xff]  ;;  %v113_v36 = vld [vmem:[%s2865_s3] sm:$0xff] }
  0x10   :  { %v1846_v34 = vld [vmem:[%s2864_s2 + $0x10] sm:$0xff]  ;;  %v132_v37 = vld [vmem:[%s2865_s3 + $0x98] sm:$0xff]  ;;  %v114_v38 = vld [vmem:[%s2865_s3 + $0x8] sm:$0xff] }
  0x11   :  { %1567 = vmatmul.msk.bf16.vlgmr.msra.gmra.mxu1 %vm64_vm0, %v39_v13  ;;  %v131_v35 = vld [vmem:[%s2865_s3 + $0x90] sm:$0xff]  ;;  %v1847_v39 = vld [vmem:[%s2864_s2 + $0x18] sm:$0xff]  ;;  %v129_v40 = vld [vmem:[%s2865_s3 + $0x80] sm:$0xff] }
  0x12   :  { %437 = vmatpush.bf16.msrb.mxu1 %v1843_v2  ;;  %292 = vperm.xlu1 %1913, %v142_v11   ;;  %v130_v41 = vld [vmem:[%s2865_s3 + $0x88] sm:$0xff]  ;;  %v617_v42 = vld [vmem:[%s2867_s5 + $0x78] sm:$0xff]  ;;  %v614_v43 = vld [vmem:[%s2867_s5 + $0x60] sm:$0xff] }
  0x13   :  { %287 = vperm.xlu0 %1912, %v141_v12   ;;  %v1848_v45 = vld [vmem:[%s2864_s2 + $0x20] sm:$0xff]  ;;  %v612_v46 = vld [vmem:[%s2867_s5 + $0x50] sm:$0xff]  ;;  %v613_v47 = vld [vmem:[%s2867_s5 + $0x58] sm:$0xff] }
  0x14   :  { %197 = vperm.xlu2 %1914, %v123_v14   ;;  %v611_v49 = vld [vmem:[%s2867_s5 + $0x48] sm:$0xff]  ;;  %v608_v50 = vld [vmem:[%s2867_s5 + $0x30] sm:$0xff]  ;;  %v606_v53 = vld [vmem:[%s2867_s5 + $0x20] sm:$0xff] }
  0x15   :  { %v1849_v51 = vld [vmem:[%s2864_s2 + $0x28] sm:$0xff]  ;;  %v616_v57 = vld [vmem:[%s2867_s5 + $0x70] sm:$0xff]  ;;  %v605_v58 = vld [vmem:[%s2867_s5 + $0x18] sm:$0xff] }
  0x16   :  { %438 = vmatpush.bf16.msrb.mxu1 %v1842_v5  ;;  %v607_v54 = vld [vmem:[%s2867_s5 + $0x28] sm:$0xff]  ;;  %v602_v59 = vld [vmem:[%s2867_s5] sm:$0xff]  ;;  %v1850_v0 = vld [vmem:[%s2864_s2 + $0x30] sm:$0xff] }
  0x17   :  { %v615_v63 = vld [vmem:[%s2867_s5 + $0x68] sm:$0xff]  ;;  %v632_v1 = vld [vmem:[%s2867_s5 + $0xf0] sm:$0xff]  ;;  %v633_v2 = vld [vmem:[%s2867_s5 + $0xf8] sm:$0xff] }
  0x18   :  { %v610_v7 = vld [vmem:[%s2867_s5 + $0x40] sm:$0xff]  ;;  %v628_v9 = vld [vmem:[%s2867_s5 + $0xd0] sm:$0xff]  ;;  %v609_v12 = vld [vmem:[%s2867_s5 + $0x38] sm:$0xff] }
  0x19   :  { %v1851_v14 = vld [vmem:[%s2864_s2 + $0x38] sm:$0xff] }
  0x1a   :  { %439 = vmatpush.bf16.msrb.mxu1 %v1841_v8  ;;  %277 = vperm.xlu1 %1913, %v139_v15   ;;  %v631_v8 = vld [vmem:[%s2867_s5 + $0xe8] sm:$0xff] }
  0x1b   :  { %202 = vperm.xlu0 %1912, %v124_v16   ;;  %v626_v16 = vld [vmem:[%s2867_s5 + $0xc0] sm:$0xff] }
  0x1c   :  { %282 = vperm.xlu2 %1914, %v140_v17   ;;  %v627_v17 = vld [vmem:[%s2867_s5 + $0xc8] sm:$0xff] }
  0x1e   :  { %440 = vmatpush.bf16.msrb.mxu1 %v1840_v10 }
  0x21   :  { %1632 = vmatmul.msk.bf16.vlgmr.msrb.gmra.mxu1 %vm64_vm0, %v1844_v20  ;;  %v604_v20 = vld [vmem:[%s2867_s5 + $0x10] sm:$0xff] }
  0x22   :  { %192 = vperm.xlu1 %1913, %v122_v18  }
  0x23   :  { %187 = vperm.xlu0 %1912, %v121_v19  }
  0x24   :  { %267 = vperm.xlu2 %1914, %v137_v21  }
  0x2a   :  { %177 = vperm.xlu1 %1913, %v119_v23   ;;  %v625_v23 = vld [vmem:[%s2867_s5 + $0xb8] sm:$0xff] }
  0x2b   :  { %272 = vperm.xlu0 %1912, %v138_v22  }
  0x2c   :  { %182 = vperm.xlu2 %1914, %v120_v24   ;;  %v622_v24 = vld [vmem:[%s2867_s5 + $0xa0] sm:$0xff] }
  0x31   :  { %1633 = vmatmul.msk.bf16.gmra.mxu1 %vm64_vm0, %v1845_v27  ;;  %v1852_v27 = vld [vmem:[%s2864_s2 + $0x40] sm:$0xff] }
  0x32   :  { %262 = vperm.xlu1 %1913, %v136_v26  }
  0x33   :  { %257 = vperm.xlu0 %1912, %v135_v25  }
  0x34   :  { %167 = vperm.xlu2 %1914, %v117_v28   ;;  %v603_v28 = vld [vmem:[%s2867_s5 + $0x8] sm:$0xff] }
  0x3a   :  { %247 = vperm.xlu1 %1913, %v133_v29  }
  0x3b   :  { %172 = vperm.xlu0 %1912, %v118_v30   ;;  %v620_v30 = vld [vmem:[%s2867_s5 + $0x90] sm:$0xff] }
  0x3c   :  { %252 = vperm.xlu2 %1914, %v134_v31   ;;  %v621_v31 = vld [vmem:[%s2867_s5 + $0x98] sm:$0xff] }
  0x41   :  { %1634 = vmatmul.msk.bf16.gmra.mxu1 %vm64_vm0, %v1846_v34 }
  0x42   :  { %162 = vperm.xlu1 %1913, %v116_v32  }
  0x43   :  { %157 = vperm.xlu0 %1912, %v115_v33  }
  0x44   :  { %237 = vperm.xlu2 %1914, %v131_v35   ;;  %v630_v35 = vld [vmem:[%s2867_s5 + $0xe0] sm:$0xff] }
  0x4a   :  { %147 = vperm.xlu1 %1913, %v113_v36  }
  0x4b   :  { %242 = vperm.xlu0 %1912, %v132_v37   ;;  %v619_v37 = vld [vmem:[%s2867_s5 + $0x88] sm:$0xff] }
  0x4c   :  { %152 = vperm.xlu2 %1914, %v114_v38   ;;  %v1196_v38 = vld [vmem:[%s2869_s7] sm:$0xff] }
  0x51   :  { %1635 = vmatmul.msk.bf16.gmra.mxu1 %vm64_vm0, %v1847_v39 }
  0x52   :  { %232 = vperm.xlu1 %1913, %v130_v41   ;;  %v629_v41 = vld [vmem:[%s2867_s5 + $0xd8] sm:$0xff] }
  0x53   :  { %227 = vperm.xlu0 %1912, %v129_v40  }
  0x54   :  { %706 = vperm.xlu2 %1914, %v616_v57  }
  0x5a   :  { %696 = vperm.xlu1 %1913, %v614_v43   ;;  %v1853_v43 = vld [vmem:[%s2864_s2 + $0x48] sm:$0xff] }
  0x5b   :  { %711 = vperm.xlu0 %1912, %v617_v42  }
  0x5c   :  { %701 = vperm.xlu2 %1914, %v615_v63   ;;  %v1202_v63 = vld [vmem:[%s2869_s7 + $0x30] sm:$0xff] }
  0x5e   :  { %v2127_v44 = vpop.permute.xlu2 %207 }
  0x61   :  { %1636 = vmatmul.msk.bf16.gmra.mxu1 %vm64_vm0, %v1848_v45 }
  0x62   :  { %691 = vperm.xlu1 %1913, %v613_v47   ;;  %v1199_v47 = vld [vmem:[%s2869_s7 + $0x18] sm:$0xff] }
  0x63   :  { %686 = vperm.xlu0 %1912, %v612_v46   ;;  %v1198_v46 = vld [vmem:[%s2869_s7 + $0x10] sm:$0xff] }
  0x64   :  { %676 = vperm.xlu2 %1914, %v610_v7  }
  0x66   :  { %v2139_v48 = vpop.permute.xlu2 %212 }
  0x6a   :  { %666 = vperm.xlu1 %1913, %v608_v50  }
  0x6b   :  { %681 = vperm.xlu0 %1912, %v611_v49  }
  0x6c   :  { %671 = vperm.xlu2 %1914, %v609_v12  }
  0x6e   :  { %v2150_v52 = vpop.permute.xlu2 %197 }
  0x71   :  { %1637 = vmatmul.msk.bf16.gmra.mxu1 %vm64_vm0, %v1849_v51  ;;  %v624_v51 = vld [vmem:[%s2867_s5 + $0xb0] sm:$0xff] }
  0x72   :  { %661 = vperm.xlu1 %1913, %v607_v54  }
  0x73   :  { %656 = vperm.xlu0 %1912, %v606_v53  }
  0x74   :  { %v2159_v55 = vpop.permute.xlu1 %297  ;;  %646 = vperm.xlu2 %1914, %v604_v20  }
  0x75   :  { %v2161_v56 = vpop.permute.xlu0 %217 }
  0x76   :  { %v2172_v60 = vpop.permute.xlu2 %282 }
  0x7a   :  { %636 = vperm.xlu1 %1913, %v602_v59   ;;  %v1201_v59 = vld [vmem:[%s2869_s7 + $0x28] sm:$0xff] }
  0x7b   :  { %651 = vperm.xlu0 %1912, %v605_v58  }
  0x7c   :  { %v2174_v61 = vpop.permute.xlu1 %302  ;;  %641 = vperm.xlu2 %1914, %v603_v28  }
  0x7d   :  { %v2176_v62 = vpop.permute.xlu0 %222 }
  0x7e   :  { %v2195_v6 = vpop.permute.xlu2 %267 }
  0x81   :  { %1638 = vmatmul.msk.bf16.gmra.mxu1 %vm64_vm0, %v1850_v0 }
  0x82   :  { %791 = vperm.xlu1 %1913, %v633_v2  }
  0x83   :  { %786 = vperm.xlu0 %1912, %v632_v1  }
  0x84   :  { %v2191_v4 = vpop.permute.xlu1 %292  ;;  %776 = vperm.xlu2 %1914, %v630_v35   ;;  %v1208_v35 = vld [vmem:[%s2869_s7 + $0x60] sm:$0xff] }
  0x85   :  { %v2193_v5 = vpop.permute.xlu0 %287 }
  0x86   :  { %v2213_v13 = vpop.permute.xlu2 %182 }
  0x8a   :  { %766 = vperm.xlu1 %1913, %v628_v9   ;;  %v623_v9 = vld [vmem:[%s2867_s5 + $0xa8] sm:$0xff] }
  0x8b   :  { %781 = vperm.xlu0 %1912, %v631_v8  }
  0x8c   :  { %v2206_v10 = vpop.permute.xlu1 %277  ;;  %771 = vperm.xlu2 %1914, %v629_v41  }
  0x8d   :  { %v2208_v11 = vpop.permute.xlu0 %202 }
  0x8e   :  { %v2218_v15 = vpop.f32.mrf.mxu1  ;;  %v2234_v22 = vpop.permute.xlu2 %167 }
  0x8f   :  { %vm1470_vm1 = vcmp.gt.f32.partialorder %v2218_v15, 0.5 }
  0x91   :  { %1639 = vmatmul.msk.bf16.gmra.mxu1 %vm64_vm0, %v1851_v14 }
  0x92   :  { %761 = vperm.xlu1 %1913, %v627_v17   ;;  %v1854_v17 = vld [vmem:[%s2864_s2 + $0x50] sm:$0xff] }
  0x93   :  { %756 = vperm.xlu0 %1912, %v626_v16  }
  0x94   :  { %v2227_v18 = vpop.permute.xlu1 %192  ;;  %746 = vperm.xlu2 %1914, %v624_v51  }
  0x95   :  { %v2229_v19 = vpop.permute.xlu0 %187 }
  0x96   :  { %v79_v21 = vpop.f32.mrf.mxu1  ;;  %v2258_v32 = vpop.permute.xlu2 %252 }
  0x97   :  { %v1204_v21 = vld [vmem:[%s2869_s7 + $0x40] sm:$0xff] }
  0x9a   :  { %736 = vperm.xlu1 %1913, %v622_v24  }
  0x9b   :  { %751 = vperm.xlu0 %1912, %v625_v23   ;;  %v1205_v23 = vld [vmem:[%s2869_s7 + $0x48] sm:$0xff] }
  0x9c   :  { %v2244_v26 = vpop.permute.xlu1 %177  ;;  %741 = vperm.xlu2 %1914, %v623_v9  }
  0x9d   :  { %v2242_v25 = vpop.permute.xlu0 %272 }
  0x9e   :  { %v442_v29 = vpop.f32.mrf.mxu1  ;;  %v2279_v42 = vpop.permute.xlu2 %237 }
  0xa1   :  { %1640 = vmatmul.msk.bf16.gmra.mxu1 %vm64_vm0, %v1852_v27  ;;  %v618_v27 = vld [vmem:[%s2867_s5 + $0x80] sm:$0xff] }
  0xa2   :  { %731 = vperm.xlu1 %1913, %v621_v31   ;;  %v1207_v31 = vld [vmem:[%s2869_s7 + $0x58] sm:$0xff] }
  0xa3   :  { %726 = vperm.xlu0 %1912, %v620_v30  }
  0xa4   :  { %v2263_v34 = vpop.permute.xlu1 %262  ;;  %716 = vperm.xlu2 %1914, %v618_v27  }
  0xa5   :  { %v2261_v33 = vpop.permute.xlu0 %257 }
  0xa6   :  { %v444_v36 = vpop.f32.mrf.mxu1  ;;  %v153_v54 = vpop.permute.xlu2 %152 }
  0xa7   :  { %v445_v0 = vadd.f32 %v444_v36, %v153_v54  ;;  %v1203_v54 = vld [vmem:[%s2869_s7 + $0x38] sm:$0xff] }
  0xa9   :  { %v523_v14 = vmax.f32 %v445_v0, 0.0  ;;  %v1857_v0 = vld [vmem:[%s2864_s2 + $0x68] sm:$0xff] }
  0xaa   :  { %1214 = vperm.xlu1 %1913, %v1196_v38   ;;  %v1197_v38 = vld [vmem:[%s2869_s7 + $0x8] sm:$0xff] }
  0xab   :  { %721 = vperm.xlu0 %1912, %v619_v37  }
  0xac   :  { %v2274_v39 = vpop.permute.xlu1 %247  ;;  %1219 = vperm.xlu2 %1914, %v1197_v38  }
  0xad   :  { %v173_v40 = vpop.permute.xlu0 %172 }
  0xae   :  { %v447_v45 = vpop.f32.mrf.mxu1 }
  0xb1   :  { %1641 = vmatmul.msk.bf16.gmra.mxu1 %vm64_vm0, %v1853_v43  ;;  %v1210_v43 = vld [vmem:[%s2869_s7 + $0x70] sm:$0xff] }
  0xb2   :  { %1229 = vperm.xlu1 %1913, %v1199_v47  }
  0xb3   :  { %1224 = vperm.xlu0 %1912, %v1198_v46   ;;  %v1200_v46 = vld [vmem:[%s2869_s7 + $0x20] sm:$0xff] }
  0xb4   :  { %v163_v49 = vpop.permute.xlu1 %162  ;;  %1234 = vperm.xlu2 %1914, %v1200_v46  }
  0xb5   :  { %v158_v50 = vpop.permute.xlu0 %157 }
  0xb6   :  { %v448_v53 = vadd.f32 %v447_v45, %v158_v50  ;;  %v449_v57 = vpop.f32.mrf.mxu1  ;;  %v1211_v45 = vld [vmem:[%s2869_s7 + $0x78] sm:$0xff] }
  0xb7   :  { %v450_v58 = vadd.f32 %v449_v57, %v163_v49 }
  0xb8   :  { %v524_v1 = vmax.f32 %v448_v53, 0.0 }
  0xb9   :  { %v525_v2 = vmax.f32 %v450_v58, 0.0  ;;  %v1856_v58 = vld [vmem:[%s2864_s2 + $0x60] sm:$0xff] }
  0xba   :  { %1244 = vperm.xlu1 %1913, %v1202_v63   ;;  %v1209_v63 = vld [vmem:[%s2869_s7 + $0x68] sm:$0xff] }
  0xbb   :  { %1239 = vperm.xlu0 %1912, %v1201_v59   ;;  %v2303_v12 = vpack.c.bf16 %v525_v2, %v524_v1 }
  0xbc   :  { %v148_v7 = vpop.permute.xlu1 %147  ;;  %1249 = vperm.xlu2 %1914, %v1203_v54  }
  0xbd   :  { %v443_v8 = vadd.f32 %v442_v29, %v148_v7  ;;  %v1858_v7 = vld [vmem:[%s2864_s2 + $0x70] sm:$0xff] }
  0xbe   :  { %v452_v20 = vpop.f32.mrf.mxu1 }
  0xbf   :  { %v522_v16 = vmax.f32 %v443_v8, 0.0  ;;  %v453_v28 = vadd.f32 %v452_v20, %v2234_v22 }
  0xc1   :  { %v2314_v24 = vpack.c.bf16 %v523_v14, %v522_v16  ;;  %1642 = vmatmul.msk.bf16.gmra.mxu1 %vm64_vm0, %v1854_v17  ;;  %v526_v36 = vmax.f32 %v453_v28, 0.0  ;;  %v1859_v14 = vld [vmem:[%s2864_s2 + $0x78] sm:$0xff] }
  0xc2   :  { %1259 = vperm.xlu1 %1913, %v1205_v23  }
  0xc3   :  { %1254 = vperm.xlu0 %1912, %v1204_v21  }
  0xc6   :  { %v454_v29 = vpop.f32.mrf.mxu1 }
  0xc7   :  { %v455_v30 = vadd.f32 %v454_v29, %v173_v40  ;;  %v1855_v40 = vld [vmem:[%s2864_s2 + $0x58] sm:$0xff] }
  0xc9   :  { %v527_v37 = vmax.f32 %v455_v30, 0.0  ;;  %v243_v30 = vpop.permute.xlu0 %242 }
  0xca   :  { %1274 = vperm.xlu1 %1913, %v1208_v35  }
  0xcb   :  { %1269 = vperm.xlu0 %1912, %v1207_v31   ;;  %v2330_v22 = vpack.c.bf16 %v527_v37, %v526_v36 }
  0xce   :  { %v457_v41 = vpop.f32.mrf.mxu1 }
  0xcf   :  { %v458_v47 = vadd.f32 %v457_v41, %v2244_v26  ;;  %v1206_v26 = vld [vmem:[%s2869_s7 + $0x50] sm:$0xff] }
  0xd0   :  { %1264 = vperm.xlu2 %1914, %v1206_v26   ;;  %v1861_v26 = vld [vmem:[%s2866_s4 + $0x4] sm:$0xf0] }
  0xd1   :  { %1643 = vmatmul.msk.bf16.gmra.mxu1 %vm64_vm0, %v1855_v40  ;;  %v528_v51 = vmax.f32 %v458_v47, 0.0  ;;  %v228_v46 = vpop.permute.xlu0 %227 }
  0xd2   :  { %1289 = vperm.xlu1 %1913, %v1211_v45  }
  0xd3   :  { %1284 = vperm.xlu0 %1912, %v1210_v43  }
  0xd6   :  { %v459_v49 = vpop.f32.mrf.mxu1 }
  0xd7   :  { %v460_v50 = vadd.f32 %v459_v49, %v2213_v13  ;;  %v233_v49 = vpop.permute.xlu1 %232 }
  0xd8   :  { %1279 = vperm.xlu2 %1914, %v1209_v63  }
  0xd9   :  { %v529_v53 = vmax.f32 %v460_v50, 0.0 }
  0xdb   :  { %v557_v57 = vpack.c.bf16 %v529_v53, %v528_v51 }
  0xde   :  { %v462_v59 = vpop.f32.mrf.mxu1 }
  0xe1   :  { %1644 = vmatmul.msk.bf16.gmra.mxu1 %vm64_vm0, %v1856_v58 }
  0xe6   :  { %v464_v13 = vpop.f32.mrf.mxu1 }
  0xee   :  { %v467_v1 = vpop.f32.mrf.mxu1 }
  0xef   :  { %v468_v37 = vadd.f32 %v467_v1, %v2150_v52 }
  0xf1   :  { %1645 = vmatmul.msk.bf16.gmra.mxu1 %vm64_vm0, %v1857_v0  ;;  %v532_v43 = vmax.f32 %v468_v37, 0.0 }
  0xf6   :  { %v469_v2 = vpop.f32.mrf.mxu1 }
  0xf7   :  { %v470_v31 = vadd.f32 %v469_v2, %v2208_v11  ;;  %v1658_v2 = vld [vmem:[%s2866_s4 + $0x10] sm:$0xf] }
  0xf9   :  { %v533_v41 = vmax.f32 %v470_v31, 0.0 }
  0xfb   :  { %v559_v45 = vpack.c.bf16 %v533_v41, %v532_v43  ;;  %v1690_v43 = vld [vmem:[%s2866_s4 + $0x50] sm:$0xf] }
  0xfe   :  { %v472_v8 = vpop.f32.mrf.mxu1 }
  0xff   :  { %v473_v27 = vadd.f32 %v472_v8, %v2127_v44 }
 0x101   :  { %1646 = vmatmul.msk.bf16.gmra.mxu1 %vm64_vm0, %v1858_v7  ;;  %v534_v38 = vmax.f32 %v473_v27, 0.0  ;;  %v1863_v7 = vld [vmem:[%s2866_s4 + $0x14] sm:$0xf0] }
 0x106   :  { %v474_v9 = vpop.f32.mrf.mxu1 }
 0x107   :  { %v475_v21 = vadd.f32 %v474_v9, %v2139_v48 }
 0x109   :  { %v535_v35 = vmax.f32 %v475_v21, 0.0  ;;  %v1666_v21 = vld [vmem:[%s2866_s4 + $0x20] sm:$0xf] }
 0x10b   :  { %v560_v48 = vpack.c.bf16 %v535_v35, %v534_v38 }
 0x10e   :  { %v477_v16 = vpop.f32.mrf.mxu1 }
 0x10f   :  { %v478_v17 = vadd.f32 %v477_v16, %v2161_v56  ;;  %v465_v56 = vadd.f32 %v464_v13, %v2227_v18 }
 0x111   :  { %1647 = vmatmul.msk.bf16.gmra.mxu1 %vm64_vm0, %v1859_v14  ;;  %v536_v28 = vmax.f32 %v478_v17, 0.0  ;;  %v531_v44 = vmax.f32 %v465_v56, 0.0  ;;  %v1659_v14 = vor.u32 %v1863_v7, %v1658_v2  ;;  %v1869_v56 = vld [vmem:[%s2866_s4 + $0x44] sm:$0xf0] }
 0x116   :  { %v479_v20 = vpop.f32.mrf.mxu1 }
 0x117   :  { %v480_v23 = vadd.f32 %v479_v20, %v2176_v62  ;;  %v463_v62 = vadd.f32 %v462_v59, %v2229_v19  ;;  %v1650_v59 = vld [vmem:[%s2866_s4] sm:$0xf] }
 0x118   :  { %v1651_v0 = vor.u32 %v1861_v26, %v1650_v59 }
 0x119   :  { %v537_v29 = vmax.f32 %v480_v23, 0.0  ;;  %v530_v47 = vmax.f32 %v463_v62, 0.0  ;;  %v1865_v23 = vld [vmem:[%s2866_s4 + $0x24] sm:$0xf0] }
 0x11b   :  { %v561_v36 = vpack.c.bf16 %v537_v29, %v536_v28  ;;  %v558_v51 = vpack.c.bf16 %v531_v44, %v530_v47  ;;  %v1667_v28 = vor.u32 %v1865_v23, %v1666_v21  ;;  %v1871_v44 = vld [vmem:[%s2866_s4 + $0x54] sm:$0xf0]  ;;  %v1730_v23 = vld [vmem:[%s2866_s4 + $0xa0] sm:$0xf] }
 0x11d   :  { %954 = vmatpush.bf16.msra.mxu2 %v561_v36  ;;  %v1867_v36 = vld [vmem:[%s2866_s4 + $0x34] sm:$0xf0] }
 0x11e   :  { %v482_v40 = vpop.f32.mrf.mxu1 }
 0x11f   :  { %v483_v11 = vadd.f32 %v482_v40, %v228_v46  ;;  %v1691_v46 = vor.u32 %v1871_v44, %v1690_v43 }
 0x121   :  { %955 = vmatpush.bf16.msra.mxu2 %v560_v48  ;;  %v538_v53 = vmax.f32 %v483_v11, 0.0 }
 0x125   :  { %956 = vmatpush.bf16.msra.mxu2 %v559_v45 }
 0x126   :  { %v484_v50 = vpop.f32.mrf.mxu1 }
 0x127   :  { %v485_v52 = vadd.f32 %v484_v50, %v233_v49  ;;  %v1698_v49 = vld [vmem:[%s2866_s4 + $0x60] sm:$0xf]  ;;  %v1873_v50 = vld [vmem:[%s2866_s4 + $0x64] sm:$0xf0] }
 0x129   :  { %v539_v54 = vmax.f32 %v485_v52, 0.0  ;;  %957 = vmatpush.bf16.msra.mxu2 %v558_v51 }
 0x12b   :  { %v2380_v18 = vpack.c.bf16 %v539_v54, %v538_v53  ;;  %v1699_v54 = vor.u32 %v1873_v50, %v1698_v49  ;;  %v1870_v49 = vld [vmem:[%s2866_s4 + $0x54] sm:$0xf]  ;;  %v1692_v50 = vld [vmem:[%s2866_s4 + $0x58] sm:$0xf0] }
 0x12d   :  { %958 = vmatpush.bf16.msra.mxu2 %v557_v57 }
 0x12e   :  { %v487_v58 = vpop.f32.mrf.mxu1 }
 0x12f   :  { %v488_v19 = vadd.f32 %v487_v58, %v2279_v42 }
 0x131   :  { %959 = vmatpush.bf16.msra.mxu2 %v2330_v22  ;;  %v540_v1 = vmax.f32 %v488_v19, 0.0 }
 0x135   :  { %960 = vmatpush.bf16.msra.mxu2 %v2303_v12 }
 0x136   :  { %v489_v13 = vpop.f32.mrf.mxu1 }
 0x137   :  { %v490_v63 = vadd.f32 %v489_v13, %v243_v30 }
 0x139   :  { %v541_v57 = vmax.f32 %v490_v63, 0.0  ;;  %961 = vmatpush.bf16.msra.mxu2 %v2314_v24 }
 0x13b   :  { %v2392_v22 = vpack.c.bf16 %v541_v57, %v540_v1 }
 0x13c   :  { %962 = vmatmul.bf16.vlgmr.msra.gmra.mxu2 %v1651_v0 }
 0x13e   :  { %v492_v42 = vpop.f32.mrf.mxu1 }
 0x13f   :  { %v493_v12 = vadd.f32 %v492_v42, %v2274_v39 }
 0x141   :  { %v542_v16 = vmax.f32 %v493_v12, 0.0 }
 0x146   :  { %v494_v8 = vpop.f32.mrf.mxu1 }
 0x147   :  { %v495_v9 = vadd.f32 %v494_v8, %v2258_v32  ;;  %v1877_v8 = vld [vmem:[%s2866_s4 + $0x84] sm:$0xf0] }
 0x149   :  { %v543_v24 = vmax.f32 %v495_v9, 0.0  ;;  %v1860_v9 = vld [vmem:[%s2866_s4 + $0x4] sm:$0xf] }
 0x14b   :  { %v2402_v17 = vpack.c.bf16 %v543_v24, %v542_v16 }
 0x14c   :  { %967 = vmatmul.bf16.gmra.mxu2 %v1659_v14  ;;  %v1652_v14 = vld [vmem:[%s2866_s4 + $0x8] sm:$0xf0] }
 0x14d   :  { %v1655_v24 = vor.u32 %v1860_v9, %v1652_v14  ;;  %v1876_v14 = vld [vmem:[%s2866_s4 + $0x84] sm:$0xf] }
 0x14e   :  { %v497_v20 = vpop.f32.mrf.mxu1 }
 0x14f   :  { %v498_v39 = vadd.f32 %v497_v20, %v2261_v33  ;;  %v1674_v33 = vld [vmem:[%s2866_s4 + $0x30] sm:$0xf]  ;;  %v1862_v20 = vld [vmem:[%s2866_s4 + $0x14] sm:$0xf] }
 0x150   :  { %v1675_v38 = vor.u32 %v1867_v36, %v1674_v33  ;;  %v1866_v33 = vld [vmem:[%s2866_s4 + $0x34] sm:$0xf]  ;;  %v1676_v36 = vld [vmem:[%s2866_s4 + $0x38] sm:$0xf0] }
 0x151   :  { %v544_v29 = vmax.f32 %v498_v39, 0.0  ;;  %v1660_v39 = vld [vmem:[%s2866_s4 + $0x18] sm:$0xf0] }
 0x156   :  { %v499_v27 = vpop.f32.mrf.mxu1 }
 0x157   :  { %v500_v32 = vadd.f32 %v499_v27, %v2263_v34  ;;  %v1682_v34 = vld [vmem:[%s2866_s4 + $0x40] sm:$0xf]  ;;  %v1881_v27 = vld [vmem:[%s2866_s4 + $0xa4] sm:$0xf0] }
 0x158   :  { %v1683_v48 = vor.u32 %v1869_v56, %v1682_v34  ;;  %v1746_v56 = vld [vmem:[%s2866_s4 + $0xc0] sm:$0xf] }
 0x159   :  { %v545_v30 = vmax.f32 %v500_v32, 0.0  ;;  %v1864_v32 = vld [vmem:[%s2866_s4 + $0x24] sm:$0xf] }
 0x15b   :  { %v565_v31 = vpack.c.bf16 %v545_v30, %v544_v29  ;;  %v1731_v29 = vor.u32 %v1881_v27, %v1730_v23 }
 0x15c   :  { %972 = vmatmul.bf16.gmra.mxu2 %v1667_v28  ;;  %v1668_v28 = vld [vmem:[%s2866_s4 + $0x28] sm:$0xf0] }
 0x15d   :  { %v1671_v30 = vor.u32 %v1864_v32, %v1668_v28  ;;  %v1878_v32 = vld [vmem:[%s2866_s4 + $0x94] sm:$0xf]  ;;  %v1724_v28 = vld [vmem:[%s2866_s4 + $0x98] sm:$0xf0] }
 0x15e   :  { %v502_v35 = vpop.f32.mrf.mxu1 }
 0x166   :  { %v504_v37 = vpop.f32.mrf.mxu1 }
 0x167   :  { %v505_v1 = vadd.f32 %v504_v37, %v2242_v25 }
 0x16c   :  { %977 = vmatmul.bf16.gmra.mxu2 %v1675_v38 }
 0x16e   :  { %v507_v40 = vpop.f32.mrf.mxu1 }
 0x16f   :  { %v508_v63 = vadd.f32 %v507_v40, %v2206_v10  ;;  %v1875_v10 = vld [vmem:[%s2866_s4 + $0x74] sm:$0xf0]  ;;  %v1679_v40 = vor.u32 %v1866_v33, %v1676_v36 }
 0x171   :  { %v548_v42 = vmax.f32 %v508_v63, 0.0 }
 0x176   :  { %v509_v41 = vpop.f32.mrf.mxu1 }
 0x17c   :  { %982 = vmatmul.bf16.gmra.mxu2 %v1683_v48  ;;  %v1868_v48 = vld [vmem:[%s2866_s4 + $0x44] sm:$0xf] }
 0x17e   :  { %v512_v62 = vpop.f32.mrf.mxu1 }
 0x17f   :  { %v513_v58 = vadd.f32 %v512_v62, %v2193_v5  ;;  %v547_v5 = vmax.f32 %v505_v1, 0.0  ;;  %v1684_v62 = vld [vmem:[%s2866_s4 + $0x48] sm:$0xf0] }
 0x180   :  { %v1687_v44 = vor.u32 %v1868_v48, %v1684_v62 }
 0x181   :  { %v550_v0 = vmax.f32 %v513_v58, 0.0  ;;  %v1762_v58 = vld [vmem:[%s2866_s4 + $0xe0] sm:$0xf] }
 0x186   :  { %v514_v45 = vpop.f32.mrf.mxu1 }
 0x187   :  { %v515_v51 = vadd.f32 %v514_v45, %v2191_v4 }
 0x189   :  { %v551_v26 = vmax.f32 %v515_v51, 0.0  ;;  %v1695_v51 = vor.u32 %v1870_v49, %v1692_v50 }
 0x18b   :  { %v568_v4 = vpack.c.bf16 %v551_v26, %v550_v0  ;;  %v1700_v26 = vld [vmem:[%s2866_s4 + $0x68] sm:$0xf0] }
 0x18c   :  { %987 = vmatmul.bf16.gmra.mxu2 %v1691_v46 }
 0x18e   :  { %v517_v47 = vpop.f32.mrf.mxu1 }
 0x18f   :  { %v518_v11 = vadd.f32 %v517_v47, %v2159_v55  ;;  %v510_v55 = vadd.f32 %v509_v41, %v2172_v60  ;;  %v1706_v60 = vld [vmem:[%s2866_s4 + $0x70] sm:$0xf]  ;;  %v1885_v41 = vld [vmem:[%s2866_s4 + $0xc4] sm:$0xf0] }
 0x190   :  { %v1707_v25 = vor.u32 %v1875_v10, %v1706_v60  ;;  %v1747_v43 = vor.u32 %v1885_v41, %v1746_v56  ;;  %v1754_v47 = vld [vmem:[%s2866_s4 + $0xd0] sm:$0xf] }
 0x191   :  { %v552_v19 = vmax.f32 %v518_v11, 0.0  ;;  %v549_v57 = vmax.f32 %v510_v55, 0.0  ;;  %v1887_v11 = vld [vmem:[%s2866_s4 + $0xd4] sm:$0xf0]  ;;  %v1872_v55 = vld [vmem:[%s2866_s4 + $0x64] sm:$0xf] }
 0x192   :  { %v1703_v0 = vor.u32 %v1872_v55, %v1700_v26 }
 0x193   :  { %v567_v12 = vpack.c.bf16 %v549_v57, %v548_v42  ;;  %v1891_v42 = vld [vmem:[%s2866_s4 + $0xf4] sm:$0xf0] }
 0x196   :  { %v519_v52 = vpop.f32.mrf.mxu1 }
 0x197   :  { %v520_v53 = vadd.f32 %v519_v52, %v2174_v61  ;;  %v503_v61 = vadd.f32 %v502_v35, %v2195_v6  ;;  %v1714_v6 = vld [vmem:[%s2866_s4 + $0x80] sm:$0xf]  ;;  %v1883_v35 = vld [vmem:[%s2866_s4 + $0xb4] sm:$0xf0]  ;;  %v1755_v52 = vor.u32 %v1887_v11, %v1754_v47 }
 0x198   :  { %v1715_v16 = vor.u32 %v1877_v8, %v1714_v6  ;;  %v2571_v6 = vpop.permute.xlu0 %711 }
 0x199   :  { %v553_v59 = vmax.f32 %v520_v53, 0.0  ;;  %v546_v2 = vmax.f32 %v503_v61, 0.0  ;;  %v1770_v61 = vld [vmem:[%s2866_s4 + $0xf0] sm:$0xf] }
 0x19a   :  { %v1771_v60 = vor.u32 %v1891_v42, %v1770_v61 }
 0x19b   :  { %v569_v13 = vpack.c.bf16 %v553_v59, %v552_v19  ;;  %v566_v7 = vpack.c.bf16 %v547_v5, %v546_v2  ;;  %v2536_v19 = vpop.permute.xlu1 %696  ;;  %v1889_v59 = vld [vmem:[%s2866_s4 + $0xe4] sm:$0xf0]  ;;  %v1874_v5 = vld [vmem:[%s2866_s4 + $0x74] sm:$0xf] }
 0x19c   :  { %992 = vmatmul.bf16.gmra.mxu2 %v1699_v54  ;;  %v2531_v54 = vpop.permute.xlu2 %706  ;;  %v1763_v63 = vor.u32 %v1889_v59, %v1762_v58 }
 0x19d   :  { %1043 = vmatpush.bf16.msra.mxu3 %v569_v13 }
 0x1a1   :  { %1044 = vmatpush.bf16.msra.mxu3 %v568_v4 }
 0x1a3   :  { %v2551_v57 = vpop.permute.xlu1 %691 }
 0x1a4   :  { %v2549_v1 = vpop.permute.xlu2 %701 }
 0x1a5   :  { %1045 = vmatpush.bf16.msra.mxu3 %v567_v12  ;;  %v1708_v12 = vld [vmem:[%s2866_s4 + $0x78] sm:$0xf0] }
 0x1a6   :  { %v1711_v10 = vor.u32 %v1874_v5, %v1708_v12 }
 0x1a9   :  { %1046 = vmatpush.bf16.msra.mxu3 %v566_v7 }
 0x1ab   :  { %v667_v7 = vpop.permute.xlu1 %666 }
 0x1ac   :  { %997 = vmatmul.bf16.gmra.mxu2 %v1707_v25  ;;  %v2567_v2 = vpop.permute.xlu2 %676 }
 0x1ad   :  { %1047 = vmatpush.bf16.msra.mxu3 %v565_v31  ;;  %v1738_v31 = vld [vmem:[%s2866_s4 + $0xb0] sm:$0xf] }
 0x1ae   :  { %v1739_v38 = vor.u32 %v1883_v35, %v1738_v31  ;;  %v1727_v35 = vor.u32 %v1878_v32, %v1724_v28 }
 0x1b1   :  { %1048 = vmatpush.bf16.msra.mxu3 %v2402_v17  ;;  %v1879_v17 = vld [vmem:[%s2866_s4 + $0x94] sm:$0xf0] }
 0x1b3   :  { %v662_v9 = vpop.permute.xlu1 %661 }
 0x1b4   :  { %v672_v8 = vpop.permute.xlu2 %671 }
 0x1b5   :  { %1049 = vmatpush.bf16.msra.mxu3 %v2392_v22  ;;  %v1722_v22 = vld [vmem:[%s2866_s4 + $0x90] sm:$0xf] }
 0x1b6   :  { %v1723_v21 = vor.u32 %v1879_v17, %v1722_v22 }
 0x1b9   :  { %1050 = vmatpush.bf16.msra.mxu3 %v2380_v18  ;;  %v1663_v18 = vor.u32 %v1862_v20, %v1660_v39 }
 0x1bb   :  { %v637_v20 = vpop.permute.xlu1 %636 }
 0x1bc   :  { %1002 = vmatmul.bf16.gmra.mxu2 %v1715_v16  ;;  %1051 = vmatmul.bf16.vlgmr.msra.gmra.mxu3 %v1655_v24  ;;  %v1716_v16 = vld [vmem:[%s2866_s4 + $0x88] sm:$0xf0]  ;;  %v2579_v24 = vpop.permute.xlu0 %686  ;;  %v647_v17 = vpop.permute.xlu2 %646 }
 0x1bd   :  { %v1719_v22 = vor.u32 %v1876_v14, %v1716_v16 }
 0x1bf   :  { %v963_v37 = vpop.f32.mrf.mxu2 }
 0x1c0   :  { %v964_v39 = vadd.f32 %v963_v37, %v637_v20  ;;  %v1884_v20 = vld [vmem:[%s2866_s4 + $0xc4] sm:$0xf] }
 0x1c4   :  { %v2581_v23 = vpop.permute.xlu0 %681  ;;  %v642_v27 = vpop.permute.xlu2 %641 }
 0x1c7   :  { %v965_v34 = vpop.f32.mrf.mxu2 }
 0x1cc   :  { %1007 = vmatmul.bf16.gmra.mxu2 %v1723_v21  ;;  %1056 = vmatmul.bf16.gmra.mxu3 %v1663_v18  ;;  %v657_v37 = vpop.permute.xlu0 %656 }
 0x1cf   :  { %v2513_v45 = vpop.f32.mrf.mxu2 }
 0x1d0   :  { %v969_v56 = vadd.f32 %v2513_v45, %v647_v17 }
 0x1d4   :  { %v652_v62 = vpop.permute.xlu0 %651 }
 0x1d7   :  { %v2515_v46 = vpop.f32.mrf.mxu2 }
 0x1dc   :  { %1012 = vmatmul.bf16.gmra.mxu2 %v1731_v29  ;;  %1061 = vmatmul.bf16.gmra.mxu3 %v1671_v30  ;;  %v966_v29 = vadd.f32 %v965_v34, %v642_v27  ;;  %v1732_v34 = vld [vmem:[%s2866_s4 + $0xa8] sm:$0xf0] }
 0x1df   :  { %v2529_v53 = vpop.f32.mrf.mxu2 }
 0x1e0   :  { %v974_v58 = vadd.f32 %v2529_v53, %v657_v37  ;;  %v2634_v37 = vpop.permute.xlu0 %786 }
 0x1e7   :  { %v2547_v13 = vpop.f32.mrf.mxu2 }
 0x1ec   :  { %1017 = vmatmul.bf16.gmra.mxu2 %v1739_v38  ;;  %1066 = vmatmul.bf16.gmra.mxu3 %v1679_v40 }
 0x1ef   :  { %v2553_v4 = vpop.f32.mrf.mxu2 }
 0x1f0   :  { %v979_v14 = vadd.f32 %v2553_v4, %v667_v7 }
 0x1f7   :  { %v2569_v25 = vpop.f32.mrf.mxu2 }
 0x1fc   :  { %1022 = vmatmul.bf16.gmra.mxu2 %v1747_v43  ;;  %1071 = vmatmul.bf16.gmra.mxu3 %v1687_v44  ;;  %v1880_v43 = vld [vmem:[%s2866_s4 + $0xa4] sm:$0xf]  ;;  %v971_v44 = vadd.f32 %v2515_v46, %v652_v62  ;;  %v1882_v46 = vld [vmem:[%s2866_s4 + $0xb4] sm:$0xf] }
 0x1fd   :  { %v1735_v50 = vor.u32 %v1880_v43, %v1732_v34  ;;  %v2644_v43 = vpop.permute.xlu0 %781 }
 0x1ff   :  { %v983_v40 = vpop.f32.mrf.mxu2 }
 0x200   :  { %v984_v7 = vadd.f32 %v983_v40, %v2567_v2  ;;  %v2636_v40 = vpop.permute.xlu2 %776 }
 0x207   :  { %v2599_v47 = vpop.f32.mrf.mxu2 }
 0x20c   :  { %1027 = vmatmul.bf16.gmra.mxu2 %v1755_v52  ;;  %1076 = vmatmul.bf16.gmra.mxu3 %v1695_v51 }
 0x20f   :  { %v2604_v26 = vpop.f32.mrf.mxu2 }
 0x217   :  { %v990_v53 = vpop.f32.mrf.mxu2 }
 0x21c   :  { %1032 = vmatmul.bf16.gmra.mxu2 %v1763_v63  ;;  %1081 = vmatmul.bf16.gmra.mxu3 %v1703_v0  ;;  %v1740_v63 = vld [vmem:[%s2866_s4 + $0xb8] sm:$0xf0]  ;;  %v976_v0 = vadd.f32 %v2547_v13, %v662_v9  ;;  %v1748_v13 = vld [vmem:[%s2866_s4 + $0xc8] sm:$0xf0]  ;;  %v981_v9 = vadd.f32 %v2569_v25, %v672_v8 }
 0x21d   :  { %v1743_v5 = vor.u32 %v1882_v46, %v1740_v63  ;;  %v1756_v25 = vld [vmem:[%s2866_s4 + $0xd8] sm:$0xf0]  ;;  %v2658_v46 = vpop.permute.xlu1 %791 }
 0x21f   :  { %v993_v17 = vpop.f32.mrf.mxu2 }
 0x227   :  { %v995_v28 = vpop.f32.mrf.mxu2 }
 0x22c   :  { %1037 = vmatmul.bf16.gmra.mxu2 %v1771_v60  ;;  %1086 = vmatmul.bf16.gmra.mxu3 %v1711_v10 }
 0x23c   :  { %1091 = vmatmul.bf16.gmra.mxu3 %v1719_v22 }
 0x23f   :  { %v1052_v21 = vpop.f32.mrf.mxu3 }
 0x240   :  { %v1053_v18 = vadd.f32 %v1052_v21, %v964_v39 }
 0x242   :  { %v1132_v33 = vmax.f32 %v1053_v18, 0.0  ;;  %v1751_v18 = vor.u32 %v1884_v20, %v1748_v13  ;;  %v994_v20 = vadd.f32 %v993_v17, %v2536_v19 }
 0x247   :  { %v1054_v30 = vpop.f32.mrf.mxu3 }
 0x248   :  { %v1055_v31 = vadd.f32 %v1054_v30, %v966_v29 }
 0x24a   :  { %v1133_v36 = vmax.f32 %v1055_v31, 0.0  ;;  %v1886_v31 = vld [vmem:[%s2866_s4 + $0xd4] sm:$0xf] }
 0x24c   :  { %1096 = vmatmul.bf16.gmra.mxu3 %v1727_v35  ;;  %v2589_v38 = vpack.c.bf16 %v1133_v36, %v1132_v33  ;;  %v1759_v35 = vor.u32 %v1886_v31, %v1756_v25  ;;  %v998_v33 = vpop.f32.mrf.mxu2  ;;  %v986_v31 = vadd.f32 %v2599_v47, %v2581_v23 }
 0x24f   :  { %v1057_v41 = vpop.f32.mrf.mxu3 }
 0x250   :  { %v1058_v48 = vadd.f32 %v1057_v41, %v969_v56  ;;  %v1888_v56 = vld [vmem:[%s2866_s4 + $0xe4] sm:$0xf]  ;;  %v1764_v41 = vld [vmem:[%s2866_s4 + $0xe8] sm:$0xf0] }
 0x251   :  { %v1767_v62 = vor.u32 %v1888_v56, %v1764_v41 }
 0x252   :  { %v1134_v52 = vmax.f32 %v1058_v48, 0.0 }
 0x254   :  { %v1000_v2 = vpop.f32.mrf.mxu2 }
 0x257   :  { %v1059_v11 = vpop.f32.mrf.mxu3 }
 0x258   :  { %v1060_v49 = vadd.f32 %v1059_v11, %v971_v44  ;;  %v2646_v44 = vpop.permute.xlu2 %771 }
 0x25a   :  { %v1135_v45 = vmax.f32 %v1060_v49, 0.0  ;;  %v1890_v49 = vld [vmem:[%s2866_s4 + $0xf4] sm:$0xf] }
 0x25c   :  { %1101 = vmatmul.bf16.gmra.mxu3 %v1735_v50  ;;  %v2601_v51 = vpack.c.bf16 %v1135_v45, %v1134_v52  ;;  %v1003_v34 = vpop.f32.mrf.mxu2  ;;  %v1772_v50 = vld [vmem:[%s2866_s4 + $0xf8] sm:$0xf0]  ;;  %v2654_v52 = vpop.permute.xlu0 %756 }
 0x25f   :  { %v1062_v59 = vpop.f32.mrf.mxu3 }
 0x260   :  { %v1063_v55 = vadd.f32 %v1062_v59, %v974_v58  ;;  %v1775_v59 = vor.u32 %v1890_v49, %v1772_v50 }
 0x262   :  { %v1136_v12 = vmax.f32 %v1063_v55, 0.0  ;;  %v2656_v55 = vpop.permute.xlu2 %746 }
 0x264   :  { %v1005_v45 = vpop.f32.mrf.mxu2 }
 0x267   :  { %v1064_v61 = vpop.f32.mrf.mxu3 }
 0x268   :  { %v1065_v42 = vadd.f32 %v1064_v61, %v976_v0  ;;  %v2660_v0 = vpop.permute.xlu0 %751 }
 0x26a   :  { %v1137_v60 = vmax.f32 %v1065_v42, 0.0  ;;  %v2662_v42 = vpop.permute.xlu2 %741 }
 0x26c   :  { %1106 = vmatmul.bf16.gmra.mxu3 %v1743_v5  ;;  %v2613_v10 = vpack.c.bf16 %v1137_v60, %v1136_v12  ;;  %v1008_v61 = vpop.f32.mrf.mxu2  ;;  %v999_v5 = vadd.f32 %v998_v33, %v2531_v54  ;;  %v996_v12 = vadd.f32 %v995_v28, %v2549_v1  ;;  %v1001_v60 = vadd.f32 %v1000_v2, %v2571_v6 }
 0x26d   :  { %v989_v54 = vadd.f32 %v2604_v26, %v2579_v24 }
 0x26f   :  { %v1067_v16 = vpop.f32.mrf.mxu3 }
 0x270   :  { %v1068_v22 = vadd.f32 %v1067_v16, %v979_v14  ;;  %v2667_v16 = vpop.permute.xlu1 %766 }
 0x272   :  { %v1138_v27 = vmax.f32 %v1068_v22, 0.0 }
 0x277   :  { %v1069_v39 = vpop.f32.mrf.mxu3 }
 0x278   :  { %v1070_v21 = vadd.f32 %v1069_v39, %v981_v9  ;;  %v991_v39 = vadd.f32 %v990_v53, %v2551_v57  ;;  %v2675_v56 = vpop.permute.xlu1 %761 }
 0x27a   :  { %v1139_v32 = vmax.f32 %v1070_v21, 0.0 }
 0x27c   :  { %1111 = vmatmul.bf16.gmra.mxu3 %v1751_v18  ;;  %v2623_v4 = vpack.c.bf16 %v1139_v32, %v1138_v27  ;;  %v727_v32 = vpop.permute.xlu0 %726 }
 0x27f   :  { %v1072_v29 = vpop.f32.mrf.mxu3 }
 0x280   :  { %v2626_v30 = vadd.f32 %v1072_v29, %v984_v7  ;;  %v1010_v7 = vpop.f32.mrf.mxu2  ;;  %v717_v29 = vpop.permute.xlu2 %716 }
 0x281   :  { %v1004_v19 = vadd.f32 %v1003_v34, %v717_v29  ;;  %v737_v50 = vpop.permute.xlu1 %736 }
 0x282   :  { %v1140_v23 = vmax.f32 %v2626_v30, 0.0 }
 0x287   :  { %v1074_v8 = vpop.f32.mrf.mxu3 }
 0x288   :  { %v1075_v53 = vadd.f32 %v1074_v8, %v986_v31 }
 0x28a   :  { %v1141_v24 = vmax.f32 %v1075_v53, 0.0  ;;  %v1897_v53 = vld [vmem:[%s2868_s6 + $0x24] sm:$0xf0] }
 0x28c   :  { %1116 = vmatmul.bf16.gmra.mxu3 %v1759_v35  ;;  %v1168_v34 = vpack.c.bf16 %v1141_v24, %v1140_v23  ;;  %v1802_v23 = vld [vmem:[%s2868_s6 + $0x30] sm:$0xf] }
 0x28f   :  { %v1077_v36 = vpop.f32.mrf.mxu3 }
 0x290   :  { %v1078_v17 = vadd.f32 %v1077_v36, %v989_v54 }
 0x292   :  { %v1142_v41 = vmax.f32 %v1078_v17, 0.0 }
 0x297   :  { %v1079_v48 = vpop.f32.mrf.mxu3 }
 0x298   :  { %v1080_v1 = vadd.f32 %v1079_v48, %v991_v39  ;;  %v722_v48 = vpop.permute.xlu0 %721 }
 0x29a   :  { %v1143_v35 = vmax.f32 %v1080_v1, 0.0 }
 0x29c   :  { %1121 = vmatmul.bf16.gmra.mxu3 %v1767_v62  ;;  %v1169_v26 = vpack.c.bf16 %v1143_v35, %v1142_v41  ;;  %v1013_v62 = vpop.f32.mrf.mxu2 }
 0x29f   :  { %v1082_v11 = vpop.f32.mrf.mxu3 }
 0x2a0   :  { %v1083_v21 = vadd.f32 %v1082_v11, %v994_v20  ;;  %v1006_v11 = vadd.f32 %v1005_v45, %v722_v48  ;;  %v732_v45 = vpop.permute.xlu1 %731 }
 0x2a1   :  { %v1011_v30 = vadd.f32 %v1010_v7, %v732_v45  ;;  %v1895_v7 = vld [vmem:[%s2868_s6 + $0x14] sm:$0xf0] }
 0x2a2   :  { %v1144_v25 = vmax.f32 %v1083_v21, 0.0 }
 0x2a7   :  { %v1084_v58 = vpop.f32.mrf.mxu3 }
 0x2a8   :  { %v1085_v13 = vadd.f32 %v1084_v58, %v996_v12 }
 0x2aa   :  { %v1145_v6 = vmax.f32 %v1085_v13, 0.0 }
 0x2ac   :  { %1126 = vmatmul.bf16.gmra.mxu3 %v1775_v59  ;;  %v1170_v2 = vpack.c.bf16 %v1145_v6, %v1144_v25  ;;  %v1009_v59 = vadd.f32 %v1008_v61, %v727_v32  ;;  %v1786_v32 = vld [vmem:[%s2868_s6 + $0x10] sm:$0xf] }
 0x2af   :  { %v1087_v63 = vpop.f32.mrf.mxu3 }
 0x2b0   :  { %v1088_v14 = vadd.f32 %v1087_v63, %v999_v5  ;;  %v1015_v63 = vpop.f32.mrf.mxu2 }
 0x2b2   :  { %v1146_v18 = vmax.f32 %v1088_v14, 0.0  ;;  %v1893_v14 = vld [vmem:[%s2868_s6 + $0x4] sm:$0xf0] }
 0x2b7   :  { %v1089_v22 = vpop.f32.mrf.mxu3 }
 0x2b8   :  { %v1090_v9 = vadd.f32 %v1089_v22, %v1001_v60  ;;  %v1778_v60 = vld [vmem:[%s2868_s6] sm:$0xf] }
 0x2b9   :  { %v1779_v20 = vor.u32 %v1893_v14, %v1778_v60  ;;  %v1903_v60 = vld [vmem:[%s2868_s6 + $0x54] sm:$0xf0] }
 0x2ba   :  { %v1147_v27 = vmax.f32 %v1090_v9, 0.0 }
 0x2bc   :  { %v1171_v28 = vpack.c.bf16 %v1147_v27, %v1146_v18  ;;  %v1016_v27 = vadd.f32 %v1015_v63, %v2662_v42 }
 0x2be   :  { %1372 = vmatpush.bf16.msra.mxu0 %v1171_v28 }
 0x2bf   :  { %v1092_v57 = vpop.f32.mrf.mxu3 }
 0x2c0   :  { %v1093_v33 = vadd.f32 %v1092_v57, %v1004_v19  ;;  %v1794_v57 = vld [vmem:[%s2868_s6 + $0x20] sm:$0xf] }
 0x2c1   :  { %v1795_v41 = vor.u32 %v1897_v53, %v1794_v57 }
 0x2c2   :  { %1373 = vmatpush.bf16.msra.mxu0 %v1170_v2  ;;  %v1148_v49 = vmax.f32 %v1093_v33, 0.0 }
 0x2c6   :  { %1374 = vmatpush.bf16.msra.mxu0 %v1169_v26 }
 0x2c7   :  { %v1094_v47 = vpop.f32.mrf.mxu3 }
 0x2c8   :  { %v1095_v36 = vadd.f32 %v1094_v47, %v1006_v11  ;;  %v1899_v47 = vld [vmem:[%s2868_s6 + $0x34] sm:$0xf0] }
 0x2ca   :  { %v1149_v8 = vmax.f32 %v1095_v36, 0.0  ;;  %1375 = vmatpush.bf16.msra.mxu0 %v1168_v34  ;;  %v1803_v34 = vor.u32 %v1899_v47, %v1802_v23 }
 0x2cc   :  { %v2678_v58 = vpack.c.bf16 %v1149_v8, %v1148_v49 }
 0x2ce   :  { %1376 = vmatpush.bf16.msra.mxu0 %v2623_v4  ;;  %v1018_v4 = vpop.f32.mrf.mxu2 }
 0x2cf   :  { %v1097_v5 = vpop.f32.mrf.mxu3  ;;  %v1019_v19 = vadd.f32 %v1018_v4, %v2656_v55 }
 0x2d0   :  { %v1098_v12 = vadd.f32 %v1097_v5, %v1009_v59  ;;  %v1901_v59 = vld [vmem:[%s2868_s6 + $0x44] sm:$0xf0] }
 0x2d2   :  { %1377 = vmatpush.bf16.msra.mxu0 %v2613_v10  ;;  %v1150_v13 = vmax.f32 %v1098_v12, 0.0 }
 0x2d6   :  { %1378 = vmatpush.bf16.msra.mxu0 %v2601_v51  ;;  %v1014_v51 = vadd.f32 %v1013_v62, %v737_v50  ;;  %v1020_v18 = vpop.f32.mrf.mxu2 }
 0x2d7   :  { %v1099_v61 = vpop.f32.mrf.mxu3  ;;  %v1021_v25 = vadd.f32 %v1020_v18, %v2660_v0  ;;  %v1905_v18 = vld [vmem:[%s2868_s6 + $0x64] sm:$0xf0] }
 0x2d8   :  { %v1100_v22 = vadd.f32 %v1099_v61, %v1011_v30  ;;  %v1818_v30 = vld [vmem:[%s2868_s6 + $0x50] sm:$0xf] }
 0x2da   :  { %v1151_v9 = vmax.f32 %v1100_v22, 0.0  ;;  %1379 = vmatpush.bf16.msra.mxu0 %v2589_v38  ;;  %v1787_v38 = vor.u32 %v1895_v7, %v1786_v32  ;;  %v1819_v22 = vor.u32 %v1903_v60, %v1818_v30 }
 0x2dc   :  { %v2690_v10 = vpack.c.bf16 %v1151_v9, %v1150_v13 }
 0x2dd   :  { %1380 = vmatmul.bf16.vlgmr.msra.gmra.mxu0 %v1779_v20 }
 0x2de   :  { %v1023_v31 = vpop.f32.mrf.mxu2 }
 0x2df   :  { %v1102_v39 = vpop.f32.mrf.mxu3  ;;  %v1024_v55 = vadd.f32 %v1023_v31, %v2654_v52  ;;  %v1810_v52 = vld [vmem:[%s2868_s6 + $0x40] sm:$0xf] }
 0x2e0   :  { %v1103_v21 = vadd.f32 %v1102_v39, %v1014_v51  ;;  %v1811_v5 = vor.u32 %v1901_v59, %v1810_v52  ;;  %v1804_v52 = vld [vmem:[%s2868_s6 + $0x38] sm:$0xf0] }
 0x2e2   :  { %v1152_v6 = vmax.f32 %v1103_v21, 0.0  ;;  %v1826_v21 = vld [vmem:[%s2868_s6 + $0x60] sm:$0xf] }
 0x2e6   :  { %v1025_v35 = vpop.f32.mrf.mxu2 }
 0x2e7   :  { %v1104_v54 = vpop.f32.mrf.mxu3 }
 0x2e8   :  { %v1105_v1 = vadd.f32 %v1104_v54, %v1016_v27 }
 0x2ea   :  { %v1153_v28 = vmax.f32 %v1105_v1, 0.0  ;;  %v1827_v1 = vor.u32 %v1905_v18, %v1826_v21 }
 0x2ec   :  { %v2699_v29 = vpack.c.bf16 %v1153_v28, %v1152_v6 }
 0x2ed   :  { %1385 = vmatmul.bf16.gmra.mxu0 %v1787_v38 }
 0x2ee   :  { %v1028_v11 = vpop.f32.mrf.mxu2 }
 0x2ef   :  { %v1107_v42 = vpop.f32.mrf.mxu3  ;;  %v1029_v6 = vadd.f32 %v1028_v11, %v2667_v16  ;;  %v1834_v16 = vld [vmem:[%s2868_s6 + $0x70] sm:$0xf] }
 0x2f0   :  { %v1108_v17 = vadd.f32 %v1107_v42, %v1019_v19  ;;  %v1026_v42 = vadd.f32 %v1025_v35, %v2675_v56  ;;  %v1907_v56 = vld [vmem:[%s2868_s6 + $0x74] sm:$0xf0] }
 0x2f2   :  { %v1154_v24 = vmax.f32 %v1108_v17, 0.0 }
 0x2f6   :  { %v1030_v49 = vpop.f32.mrf.mxu2 }
 0x2f7   :  { %v1109_v33 = vpop.f32.mrf.mxu3 }
 0x2f8   :  { %v1110_v2 = vadd.f32 %v1109_v33, %v1021_v25 }
 0x2fa   :  { %v1155_v26 = vmax.f32 %v1110_v2, 0.0 }
 0x2fc   :  { %v2709_v48 = vpack.c.bf16 %v1155_v26, %v1154_v24  ;;  %v1835_v24 = vor.u32 %v1907_v56, %v1834_v16  ;;  %v1892_v26 = vld [vmem:[%s2868_s6 + $0x4] sm:$0xf] }
 0x2fd   :  { %1390 = vmatmul.bf16.gmra.mxu0 %v1795_v41 }
 0x2fe   :  { %v1033_v50 = vpop.f32.mrf.mxu2 }
 0x2ff   :  { %v1112_v0 = vpop.f32.mrf.mxu3  ;;  %v1034_v32 = vadd.f32 %v1033_v50, %v2636_v40  ;;  %v1898_v50 = vld [vmem:[%s2868_s6 + $0x34] sm:$0xf] }
 0x300   :  { %v1113_v62 = vadd.f32 %v1112_v0, %v1024_v55  ;;  %v1780_v55 = vld [vmem:[%s2868_s6 + $0x8] sm:$0xf0]  ;;  %v1807_v59 = vor.u32 %v1898_v50, %v1804_v52 }
 0x301   :  { %v1783_v0 = vor.u32 %v1892_v26, %v1780_v55 }
 0x302   :  { %v1156_v41 = vmax.f32 %v1113_v62, 0.0 }
 0x306   :  { %v1035_v12 = vpop.f32.mrf.mxu2 }
 0x307   :  { %v1114_v36 = vpop.f32.mrf.mxu3  ;;  %v1036_v9 = vadd.f32 %v1035_v12, %v2644_v43  ;;  %v1900_v12 = vld [vmem:[%s2868_s6 + $0x44] sm:$0xf] }
 0x308   :  { %v1115_v40 = vadd.f32 %v1114_v36, %v1026_v42  ;;  %v1896_v36 = vld [vmem:[%s2868_s6 + $0x24] sm:$0xf]  ;;  %v1220_v42 = vpop.permute.xlu2 %1219 }
 0x30d   :  { %1395 = vmatmul.bf16.gmra.mxu0 %v1803_v34 }
 0x30e   :  { %v1038_v61 = vpop.f32.mrf.mxu2 }
 0x30f   :  { %v1117_v8 = vpop.f32.mrf.mxu3  ;;  %v1039_v13 = vadd.f32 %v1038_v61, %v2634_v37  ;;  %v1031_v37 = vadd.f32 %v1030_v49, %v2646_v44  ;;  %v1157_v44 = vmax.f32 %v1115_v40, 0.0  ;;  %v1902_v61 = vld [vmem:[%s2868_s6 + $0x54] sm:$0xf] }
 0x310   :  { %v1118_v17 = vadd.f32 %v1117_v8, %v1029_v6 }
 0x311   :  { %v1176_v35 = vpack.c.bf16 %v1157_v44, %v1156_v41 }
 0x312   :  { %v1158_v33 = vmax.f32 %v1118_v17, 0.0 }
 0x316   :  { %v1040_v20 = vpop.f32.mrf.mxu2 }
 0x317   :  { %v1119_v63 = vpop.f32.mrf.mxu3  ;;  %v1041_v51 = vadd.f32 %v1040_v20, %v2658_v46 }
 0x318   :  { %v1120_v28 = vadd.f32 %v1119_v63, %v1031_v37  ;;  %v2827_v37 = vsel %vm1470_vm1, 1, %v1941_v3 }
 0x31a   :  { %v1159_v57 = vmax.f32 %v1120_v28, 0.0 }
 0x31c   :  { %v1177_v2 = vpack.c.bf16 %v1159_v57, %v1158_v33  ;;  %v1225_v57 = vpop.permute.xlu0 %1224 }
 0x31d   :  { %1400 = vmatmul.bf16.gmra.mxu0 %v1811_v5 }
 0x31f   :  { %v1122_v45 = vpop.f32.mrf.mxu3 }
 0x320   :  { %v1123_v43 = vadd.f32 %v1122_v45, %v1034_v32  ;;  %v1812_v45 = vld [vmem:[%s2868_s6 + $0x48] sm:$0xf0]  ;;  %v1836_v32 = vld [vmem:[%s2868_s6 + $0x78] sm:$0xf0] }
 0x321   :  { %v1815_v30 = vor.u32 %v1900_v12, %v1812_v45 }
 0x322   :  { %v1160_v25 = vmax.f32 %v1123_v43, 0.0  ;;  %v1215_v43 = vpop.permute.xlu1 %1214 }
 0x324   :  { %v1240_v50 = vpop.permute.xlu0 %1239 }
 0x327   :  { %v1124_v14 = vpop.f32.mrf.mxu3 }
 0x328   :  { %v1125_v7 = vadd.f32 %v1124_v14, %v1036_v9  ;;  %v1904_v9 = vld [vmem:[%s2868_s6 + $0x64] sm:$0xf] }
 0x32a   :  { %v1161_v31 = vmax.f32 %v1125_v7, 0.0 }
 0x32c   :  { %v1178_v53 = vpack.c.bf16 %v1161_v31, %v1160_v25 }
 0x32d   :  { %1405 = vmatmul.bf16.gmra.mxu0 %v1819_v22  ;;  %v1820_v22 = vld [vmem:[%s2868_s6 + $0x58] sm:$0xf0] }
 0x32f   :  { %v1127_v4 = vpop.f32.mrf.mxu3 }
 0x330   :  { %v1128_v39 = vadd.f32 %v1127_v4, %v1039_v13  ;;  %v1823_v4 = vor.u32 %v1902_v61, %v1820_v22  ;;  %v1490_v61 = vperm.slane %v2827_v37, 3 }
 0x332   :  { %v1162_v38 = vmax.f32 %v1128_v39, 0.0  ;;  %vm1491_vm5 = vcmp.eq.s32.totalorder %v1490_v61, 1 }
 0x337   :  { %v1129_v27 = vpop.f32.mrf.mxu3 }
 0x338   :  { %v1130_v54 = vadd.f32 %v1129_v27, %v1041_v51  ;;  %v1828_v51 = vld [vmem:[%s2868_s6 + $0x68] sm:$0xf0]  ;;  %v1906_v27 = vld [vmem:[%s2868_s6 + $0x74] sm:$0xf] }
 0x339   :  { %v1831_v39 = vor.u32 %v1904_v9, %v1828_v51  ;;  %v1839_v7 = vor.u32 %v1906_v27, %v1836_v32 }
 0x33a   :  { %v1163_v46 = vmax.f32 %v1130_v54, 0.0 }
 0x33c   :  { %v1179_v19 = vpack.c.bf16 %v1163_v46, %v1162_v38  ;;  %v1472_v38 = vperm.slane %v2827_v37, 0 }
 0x33d   :  { %1410 = vmatmul.bf16.gmra.mxu0 %v1827_v1 }
 0x33e   :  { %1421 = vmatpush.bf16.msrb.mxu0 %v1179_v19  ;;  %vm2830_vm2 = vcmp.eq.s32.totalorder %v1472_v38, 1  ;;  %v1255_v38 = vpop.permute.xlu0 %1254 }
 0x342   :  { %1422 = vmatpush.bf16.msrb.mxu0 %v1178_v53  ;;  %v1478_v53 = vperm.slane %v2827_v37, 1 }
 0x344   :  { %vm1479_vm3 = vcmp.eq.s32.totalorder %v1478_v53, 1  ;;  %v1502_v53 = vperm.slane %v2827_v37, 5 }
 0x346   :  { %1423 = vmatpush.bf16.msrb.mxu0 %v1177_v2  ;;  %vm1503_vm7 = vcmp.eq.s32.totalorder %v1502_v53, 1 }
 0x34a   :  { %1424 = vmatpush.bf16.msrb.mxu0 %v1176_v35  ;;  %v1230_v35 = vpop.permute.xlu1 %1229 }
 0x34d   :  { %1415 = vmatmul.bf16.gmra.mxu0 %v1835_v24 }
 0x34e   :  { %1425 = vmatpush.bf16.msrb.mxu0 %v2709_v48 }
 0x352   :  { %1426 = vmatpush.bf16.msrb.mxu0 %v2699_v29  ;;  %v1894_v29 = vld [vmem:[%s2868_s6 + $0x14] sm:$0xf] }
 0x356   :  { %1427 = vmatpush.bf16.msrb.mxu0 %v2690_v10  ;;  %v1788_v10 = vld [vmem:[%s2868_s6 + $0x18] sm:$0xf0] }
 0x357   :  { %v1791_v48 = vor.u32 %v1894_v29, %v1788_v10  ;;  %v1235_v29 = vpop.permute.xlu2 %1234  ;;  %v1484_v10 = vperm.slane %v2827_v37, 2 }
 0x359   :  { %vm1485_vm4 = vcmp.eq.s32.totalorder %v1484_v10, 1 }
 0x35a   :  { %v1381_v62 = vpop.f32.mrf.mxu0  ;;  %1428 = vmatpush.bf16.msrb.mxu0 %v2678_v58  ;;  %v1796_v58 = vld [vmem:[%s2868_s6 + $0x28] sm:$0xf0]  ;;  %s1942_s6 = smov [#allocation2]  }
 0x35b   :  { %v1799_v34 = vor.u32 %v1896_v36, %v1796_v58  ;;  %v1382_v46 = vadd.f32 %v1381_v62, %v1215_v43  ;;  %s1537_s26 = sshll.u32 %s1942_s6, 4  ;;  %s1538_s26 = int_to_ptr.vmem [resolvable:$true] %s1537_s26 }
 0x35d   :  { %1429 = vmatmul.bf16.vlgmr.msrb.gmra.mxu0 %v1783_v0 }
 0x362   :  { %v1383_v11 = vpop.f32.mrf.mxu0 }
 0x363   :  { %v1384_v17 = vadd.f32 %v1383_v11, %v1220_v42 }
 0x36a   :  { %v1386_v23 = vpop.f32.mrf.mxu0 }
 0x36b   :  { %v1387_v33 = vadd.f32 %v1386_v23, %v1225_v57 }
 0x36d   :  { %1434 = vmatmul.bf16.gmra.mxu0 %v1791_v48 }
 0x372   :  { %v1388_v47 = vpop.f32.mrf.mxu0 }
 0x373   :  { %v1389_v24 = vadd.f32 %v1388_v47, %v1230_v35 }
 0x37a   :  { %v2771_v49 = vpop.f32.mrf.mxu0 }
 0x37b   :  { %v1392_v48 = vadd.f32 %v2771_v49, %v1235_v29 }
 0x37d   :  { %1439 = vmatmul.bf16.gmra.mxu0 %v1799_v34 }
 0x382   :  { %v2773_v8 = vpop.f32.mrf.mxu0 }
 0x383   :  { %v1394_v52 = vadd.f32 %v2773_v8, %v1240_v50 }
 0x38a   :  { %v2781_v63 = vpop.f32.mrf.mxu0 }
 0x38d   :  { %1444 = vmatmul.bf16.gmra.mxu0 %v1807_v59 }
 0x392   :  { %v2783_v5 = vpop.f32.mrf.mxu0 }
 0x39a   :  { %v2791_v60 = vpop.f32.mrf.mxu0 }
 0x39d   :  { %1449 = vmatmul.bf16.gmra.mxu0 %v1815_v30  ;;  %v1245_v30 = vpop.permute.xlu1 %1244 }
 0x39e   :  { %v1397_v22 = vadd.f32 %v2781_v63, %v1245_v30 }
 0x3a2   :  { %v2793_v14 = vpop.f32.mrf.mxu0 }
 0x3a5   :  { %v1260_v42 = vpop.permute.xlu1 %1259 }
 0x3aa   :  { %v2801_v20 = vpop.f32.mrf.mxu0 }
 0x3ad   :  { %1454 = vmatmul.bf16.gmra.mxu0 %v1823_v4 }
 0x3b2   :  { %v2803_v13 = vpop.f32.mrf.mxu0 }
 0x3ba   :  { %v2811_v21 = vpop.f32.mrf.mxu0 }
 0x3bd   :  { %1459 = vmatmul.bf16.gmra.mxu0 %v1831_v39  ;;  %v1250_v39 = vpop.permute.xlu2 %1249 }
 0x3be   :  { %v1399_v27 = vadd.f32 %v2783_v5, %v1250_v39 }
 0x3c2   :  { %v2813_v18 = vpop.f32.mrf.mxu0 }
 0x3c5   :  { %v1265_v57 = vpop.permute.xlu2 %1264 }
 0x3ca   :  { %v2821_v54 = vpop.f32.mrf.mxu0 }
 0x3cd   :  { %1464 = vmatmul.bf16.gmra.mxu0 %v1839_v7 }
 0x3d2   :  { %v2824_v1 = vpop.f32.mrf.mxu0 }
 0x3da   :  { %v1430_v6 = vpop.f32.mrf.mxu0 }
 0x3db   :  { %v1431_v28 = vadd.f32 %v1430_v6, %v1382_v46  ;;  %v1496_v46 = vperm.slane %v2827_v37, 4  ;;  %v1402_v6 = vadd.f32 %v2791_v60, %v1255_v38 }
 0x3dd   :  { %v1474_v19 = vsel %vm2830_vm2, %v1431_v28, -3.4028235e+38  ;;  %vm1497_vm6 = vcmp.eq.s32.totalorder %v1496_v46, 1 }
 0x3de   :  { %v1476_v41 = vmax.f32 %v1474_v19, -3.4028235e+38 }
 0x3e2   :  { %v1432_v25 = vpop.f32.mrf.mxu0 }
 0x3e3   :  { %v1433_v40 = vadd.f32 %v1432_v25, %v1384_v17  ;;  %v1404_v17 = vadd.f32 %v2793_v14, %v1260_v42 }
 0x3e5   :  { %v1475_v3 = vsel %vm2830_vm2, %v1433_v40, -3.4028235e+38 }
 0x3e6   :  { %v1477_v0 = vmax.f32 %v1475_v3, -3.4028235e+38 }
 0x3ea   :  { %v1435_v44 = vpop.f32.mrf.mxu0 }
 0x3eb   :  { %v1436_v2 = vadd.f32 %v1435_v44, %v1387_v33  ;;  %v1407_v33 = vadd.f32 %v2801_v20, %v1265_v57 }
 0x3ed   :  { %v1480_v16 = vsel %vm1479_vm3, %v1436_v2, -3.4028235e+38 }
 0x3ee   :  { %v1482_v56 = vmax.f32 %v1476_v41, %v1480_v16  ;;  %v1270_v16 = vpop.permute.xlu0 %1269 }
 0x3f2   :  { %v1437_v26 = vpop.f32.mrf.mxu0 }
 0x3f3   :  { %v1438_v55 = vadd.f32 %v1437_v26, %v1389_v24 }
 0x3f5   :  { %v1481_v62 = vsel %vm1479_vm3, %v1438_v55, -3.4028235e+38  ;;  %v1520_v55 = vrot.slane %v2218_v15, 4 }
 0x3f6   :  { %v1483_v11 = vmax.f32 %v1477_v0, %v1481_v62  ;;  %v1275_v0 = vpop.permute.xlu1 %1274  ;;  %v1508_v62 = vperm.slane %v2827_v37, 6 }
 0x3f7   :  { %v1521_v29 = vmax.f32 %v2218_v15, %v1520_v55 }
 0x3f8   :  { %vm1509_vm8 = vcmp.eq.s32.totalorder %v1508_v62, 1 }
 0x3fa   :  { %v1440_v36 = vpop.f32.mrf.mxu0 }
 0x3fb   :  { %v1441_v23 = vadd.f32 %v1440_v36, %v1392_v48 }
 0x3fd   :  { %v1486_v58 = vsel %vm1485_vm4, %v1441_v23, -3.4028235e+38  ;;  %v1522_v23 = vrot.slane %v1521_v29, 2 }
 0x3fe   :  { %v1488_v34 = vmax.f32 %v1482_v56, %v1486_v58  ;;  %v1409_v56 = vadd.f32 %v2803_v13, %v1270_v16  ;;  %v1280_v13 = vpop.permute.xlu2 %1279 }
 0x3ff   :  { %v1414_v58 = vadd.f32 %v2813_v18, %v1280_v13  ;;  %v1523_v50 = vmax.f32 %v1521_v29, %v1522_v23 }
 0x402   :  { %v1442_v59 = vpop.f32.mrf.mxu0 }
 0x403   :  { %v1443_v47 = vadd.f32 %v1442_v59, %v1394_v52 }
 0x405   :  { %v1487_v12 = vsel %vm1485_vm4, %v1443_v47, -3.4028235e+38 }
 0x406   :  { %v1489_v45 = vmax.f32 %v1483_v11, %v1487_v12  ;;  %v1412_v11 = vadd.f32 %v2811_v21, %v1275_v0  ;;  %v1524_v12 = vrot.slane %v1523_v50, 1  ;;  %v1514_v21 = vperm.slane %v2827_v37, 7 }
 0x408   :  { %vm1515_vm9 = vcmp.eq.s32.totalorder %v1514_v21, 1 }
 0x40a   :  { %v1445_v4 = vpop.f32.mrf.mxu0 }
 0x40b   :  { %v1446_v9 = vadd.f32 %v1445_v4, %v1397_v22  ;;  %v1525_v22 = vmax.f32 %v1523_v50, %v1524_v12 }
 0x40d   :  { %v1492_v49 = vsel %vm1491_vm5, %v1446_v9, -3.4028235e+38  ;;  %vm1526_vm10 = vcmp.gt.f32.partialorder %v1525_v22, 0.5 }
 0x40e   :  { %v1494_v51 = vmax.f32 %v1488_v34, %v1492_v49  ;;  %v1290_v49 = vpop.permute.xlu1 %1289 }
 0x412   :  { %v1447_v32 = vpop.f32.mrf.mxu0 }
 0x413   :  { %v1448_v7 = vadd.f32 %v1447_v32, %v1399_v27 }
 0x415   :  { %v1493_v8 = vsel %vm1491_vm5, %v1448_v7, -3.4028235e+38 }
 0x416   :  { %v1495_v43 = vmax.f32 %v1489_v45, %v1493_v8  ;;  %v1285_v45 = vpop.permute.xlu0 %1284 }
 0x417   :  { %v1417_v30 = vadd.f32 %v2821_v54, %v1285_v45 }
 0x41a   :  { %v1450_v28 = vpop.f32.mrf.mxu0 }
 0x41b   :  { %v1451_v31 = vadd.f32 %v1450_v28, %v1402_v6 }
 0x41d   :  { %v1498_v63 = vsel %vm1497_vm6, %v1451_v31, -3.4028235e+38 }
 0x41e   :  { %v1500_v19 = vmax.f32 %v1494_v51, %v1498_v63  ;;  %v1419_v51 = vadd.f32 %v2824_v1, %v1290_v49 }
 0x422   :  { %v1452_v25 = vpop.f32.mrf.mxu0 }
 0x423   :  { %v1453_v40 = vadd.f32 %v1452_v25, %v1404_v17 }
 0x425   :  { %v1499_v5 = vsel %vm1497_vm6, %v1453_v40, -3.4028235e+38 }
 0x426   :  { %v1501_v3 = vmax.f32 %v1495_v43, %v1499_v5 }
 0x42a   :  { %v1455_v44 = vpop.f32.mrf.mxu0 }
 0x42b   :  { %v1456_v2 = vadd.f32 %v1455_v44, %v1407_v33 }
 0x42d   :  { %v1504_v60 = vsel %vm1503_vm7, %v1456_v2, -3.4028235e+38 }
 0x42e   :  { %v1506_v41 = vmax.f32 %v1500_v19, %v1504_v60 }
 0x432   :  { %v1457_v35 = vpop.f32.mrf.mxu0 }
 0x433   :  { %v1458_v24 = vadd.f32 %v1457_v35, %v1409_v56 }
 0x435   :  { %v1505_v14 = vsel %vm1503_vm7, %v1458_v24, -3.4028235e+38 }
 0x436   :  { %v1507_v26 = vmax.f32 %v1501_v3, %v1505_v14 }
 0x43a   :  { %v1460_v20 = vpop.f32.mrf.mxu0 }
 0x43b   :  { %v1461_v10 = vadd.f32 %v1460_v20, %v1412_v11 }
 0x43d   :  { %v1510_v48 = vsel %vm1509_vm8, %v1461_v10, -3.4028235e+38 }
 0x43e   :  { %v1512_v36 = vmax.f32 %v1506_v41, %v1510_v48 }
 0x442   :  { %v1462_v34 = vpop.f32.mrf.mxu0 }
 0x443   :  { %v1463_v52 = vadd.f32 %v1462_v34, %v1414_v58 }
 0x445   :  { %v1511_v59 = vsel %vm1509_vm8, %v1463_v52, -3.4028235e+38 }
 0x446   :  { %v1513_v47 = vmax.f32 %v1507_v26, %v1511_v59 }
 0x44a   :  { %v1465_v15 = vpop.f32.mrf.mxu0 }
 0x44b   :  { %v1466_v61 = vadd.f32 %v1465_v15, %v1417_v30 }
 0x44d   :  { %v1516_v4 = vsel %vm1515_vm9, %v1466_v61, -3.4028235e+38 }
 0x44e   :  { %v1518_v9 = vmax.f32 %v1512_v36, %v1516_v4 }
 0x450   :  { %v1529_v18 = vsel %vm1526_vm10, %v1518_v9, 0.0 }
 0x451   :  { %1531 = vst [vmem:[#allocation2] sm:$0xff] %v1529_v18 }
 0x452   :  { %v1467_v39 = vpop.f32.mrf.mxu0 }
 0x453   :  { %v1468_v27 = vadd.f32 %v1467_v39, %v1419_v51 }
 0x455   :  { %v1517_v54 = vsel %vm1515_vm9, %v1468_v27, -3.4028235e+38 }
 0x456   :  { %v1519_v37 = vmax.f32 %v1513_v47, %v1517_v54 }
 0x458   :  { %v1530_v32 = vsel %vm1526_vm10, %v1519_v37, 0.0 }
 0x459   :  { %1532 = vst [vmem:[#allocation2 + $0x8] sm:$0xff] %v1530_v32 }
 0x45a   :  { %1545 = dma.vmem_to_hbm [thread:$0]  %s1538_s26, 256, %s1540_s29, [#allocation3], %s1943_s30, %s1943_s30, %s1944_s9  }
 0x45b   :  { %1939 = dma.done.wait [#allocation3], 256  }
 0x45c   :  { %1940 = vsyncadd [#allocation3], 4294967040 }
 0x45d   :  { %1550 = vsyncpa [#allocation3], 1 }

</bundles_post_ra>
